<compile_context>
chip_gen: v5e
topology: v5e:2x2
jax: 0.10.0
libtpu: 0.0.40
codegen_flags: <defaults>
</compile_context>

<pallas_src>
import jax
import jax.numpy as jnp
from jax.experimental import pallas as pl
from jax.experimental.pallas import tpu as pltpu


def _lstm_fused_kernel(x_ref,        # (T*B, D)  f32: time-major flattened inputs
                       wih0p_ref,    # (D, 8H)   f32: layer-0 input weights (packed cols)
                       bl0_ref,      # (1, 8H)   f32: layer-0 bias in layer-0 lanes, 0 elsewhere
                       bl1_ref,      # (1, 8H)   f32: layer-1 bias in layer-1 lanes, 0 elsewhere
                       wfused_ref,   # (2H, 8H)  f32: [[W_hh0, W_ih1],[0, W_hh1]] (packed cols)
                       wfcp_ref,     # (2H, OP)  f32: fc weight, rows [H:2H) = W_fc, lane-padded
                       bfcp_ref,     # (1, OP)   f32: fc bias, lane-padded
                       out_ref):     # (B, OP)   f32
    B, _ = out_ref.shape
    TB, _ = x_ref.shape
    T = TB // B
    G8 = wih0p_ref.shape[1]
    H = G8 // 8
    H2 = 2 * H

    # Off the recurrent chain: layer-0 input projection for ALL timesteps in one
    # MXU matmul, layer-0 bias folded in.  Layer-1 lanes of `base` are zero.
    base = jnp.dot(x_ref[...], wih0p_ref[...],
                   preferred_element_type=jnp.float32) + bl0_ref[...]

    wfused = wfused_ref[...]
    bl1 = bl1_ref[...]

    # Lane mask of the packed g-gate block: run ONE sigmoid over the whole
    # (B, 8H) vreg and recover tanh via tanh(x) = 2*sigmoid(2x) - 1 on the
    # g lanes (the *2 was folded into the weights/biases at prep time).
    lane = jax.lax.broadcasted_iota(jnp.int32, (B, G8), 1)
    g_lanes = (lane >= 2 * H2) & (lane < 3 * H2)

    def activate(gates):
        s = jax.nn.sigmoid(gates)
        return jnp.where(g_lanes, 2.0 * s - 1.0, s)

    hpack = jnp.zeros((B, H2), jnp.float32)   # [h0 | h1]
    cpack = jnp.zeros((B, H2), jnp.float32)   # [c0 | c1]

    # Wavefront recurrence: iteration s updates layer 0 at time s and layer 1
    # at time s-1, so ONE fused dot + ONE packed elementwise block per step.
    for s in range(T + 1):
        if s == 0:
            # hpack == 0 -> recurrent term is zero (skip the dot); layer-1 lanes
            # are 0 too, which keeps layer-1 state exactly zero this iteration.
            gates = base[0:B, :]
        elif s < T:
            gates = (jnp.dot(hpack, wfused, preferred_element_type=jnp.float32)
                     + base[s * B:(s + 1) * B, :] + bl1)
        else:
            # Last wavefront step: only the layer-1 half is meaningful; the
            # layer-0 half of hpack is never read again (fc rows [0:H) are 0).
            gates = (jnp.dot(hpack, wfused, preferred_element_type=jnp.float32)
                     + bl1)

        act = activate(gates)
        i_g = act[:, 0 * H2:1 * H2]
        f_g = act[:, 1 * H2:2 * H2]
        g_g = act[:, 2 * H2:3 * H2]
        o_g = act[:, 3 * H2:4 * H2]
        cpack = f_g * cpack + i_g * g_g
        hpack = o_g * jnp.tanh(cpack)

    # Final FC on h1_{T-1} (lanes [H:2H) of hpack; fc rows [0:H) are zero).
    # OP is a multiple of 128 -> lane-dense store.
    out = (jnp.dot(hpack, wfcp_ref[...], preferred_element_type=jnp.float32)
           + bfcp_ref[...])
    out_ref[...] = out.astype(out_ref.dtype)


def prepare_params(params):
    """One-time weight prep (hoisted out of the per-call forward).

    Builds the packed/fused, g-gate-prescaled, lane-padded operands the kernel
    consumes.  Gate layout in the 8H axis is gate-major, layer-minor:
    [i0 i1 | f0 f1 | g0 g1 | o0 o1], each sub-block H lanes wide.
    """
    H = params["whh0"].shape[0]
    O = params["bfc"].shape[-1]
    G8 = 8 * H
    OP = ((O + 127) // 128) * 128

    # Pre-scale the g-gate (3rd) block by 2 -> in-kernel tanh(x)=2*sigmoid(2x)-1.
    scale = jnp.concatenate([jnp.ones((H,), jnp.float32),
                             jnp.ones((H,), jnp.float32),
                             jnp.full((H,), 2.0, jnp.float32),
                             jnp.ones((H,), jnp.float32)])

    def sc(w4):                       # scale g-gate columns of a (*, 4H) array
        return w4 * scale[None, :]

    def to8(w4, layer):               # (*, 4H) -> (*, 8H) packed columns
        rows = w4.shape[0]
        w8 = jnp.zeros((rows, G8), jnp.float32)
        for k in range(4):            # gates i, f, g, o
            dst = (2 * k + layer) * H
            w8 = w8.at[:, dst:dst + H].set(w4[:, k * H:(k + 1) * H])
        return w8

    wih0p = to8(sc(params["wih0"]), 0)                                 # (D, 8H)
    bl0 = to8(sc(params["b0"]), 0)                                     # (1, 8H)
    bl1 = to8(sc(params["b1"]), 1)                                     # (1, 8H)
    wfused = jnp.concatenate(
        [to8(sc(params["whh0"]), 0) + to8(sc(params["wih1"]), 1),      # rows from h0
         to8(sc(params["whh1"]), 1)],                                  # rows from h1
        axis=0)                                                        # (2H, 8H)
    wfcp = jnp.zeros((2 * H, OP), jnp.float32).at[H:, :O].set(
        params["wfc"].astype(jnp.float32))                             # (2H, OP)
    bfcp = jnp.zeros((1, OP), jnp.float32).at[:, :O].set(params["bfc"])

    return {"wih0p": wih0p, "bl0": bl0, "bl1": bl1, "wfused": wfused,
            "wfcp": wfcp, "bfcp": bfcp}


def lstm_model_forward(input_ids, attention_mask, prepared, *, output_dim):
    """Equivalent of LSTMModel.forward(input_ids, attention_mask).

    input_ids: (B, T, input_dim) f32. attention_mask is ignored (as in the
    PyTorch module). Returns (B, output_dim) f32.
    """
    del attention_mask  # unused by the reference module's forward
    B, T, D = input_ids.shape
    OP = prepared["bfcp"].shape[-1]

    # Time-major flatten so the in-kernel projection is one (T*B, D) x (D, 8H)
    # matmul and per-step rows are contiguous leading slices.
    x_flat = jnp.swapaxes(input_ids, 0, 1).reshape(T * B, D)

    vmem = pl.BlockSpec(memory_space=pltpu.MemorySpace.VMEM)

    out_pad = pl.pallas_call(
        _lstm_fused_kernel,
        out_shape=jax.ShapeDtypeStruct((B, OP), jnp.float32),
        in_specs=[vmem] * 7,
        out_specs=vmem,
    )(x_flat, prepared["wih0p"], prepared["bl0"], prepared["bl1"],
      prepared["wfused"], prepared["wfcp"], prepared["bfcp"])

    return out_pad[:, :output_dim]


def init_params(key, input_dim, hidden_dim, output_dim):
    """Deterministic synthetic parameters matching nn.LSTM(2 layers) + nn.Linear.

    Stored pre-transposed to (in_features, 4H) with PyTorch gate order
    [i, f, g, o]; biases b_ih + b_hh pre-summed.
    """
    ks = jax.random.split(key, 10)
    scale = 0.1

    def rnd(k, shape):
        return scale * jax.random.normal(k, shape, dtype=jnp.float32)

    return {
        "wih0": rnd(ks[0], (input_dim, 4 * hidden_dim)),
        "whh0": rnd(ks[1], (hidden_dim, 4 * hidden_dim)),
        "b0": rnd(ks[2], (1, 4 * hidden_dim)) + rnd(ks[3], (1, 4 * hidden_dim)),
        "wih1": rnd(ks[4], (hidden_dim, 4 * hidden_dim)),
        "whh1": rnd(ks[5], (hidden_dim, 4 * hidden_dim)),
        "b1": rnd(ks[6], (1, 4 * hidden_dim)) + rnd(ks[7], (1, 4 * hidden_dim)),
        "wfc": rnd(ks[8], (hidden_dim, output_dim)),
        "bfc": rnd(ks[9], (1, output_dim)),
    }


def reference_forward(input_ids, params):
    """Plain-JAX (non-Pallas) 2-layer LSTM + FC, for correctness checking."""
    B, T, _ = input_ids.shape
    H = params["whh0"].shape[0]
    h0 = c0 = h1 = c1 = jnp.zeros((B, H), jnp.float32)

    def cell(g, c):
        i, f, gg, o = jnp.split(g, 4, axis=-1)
        i, f, o = jax.nn.sigmoid(i), jax.nn.sigmoid(f), jax.nn.sigmoid(o)
        gg = jnp.tanh(gg)
        c_new = f * c + i * gg
        return o * jnp.tanh(c_new), c_new

    for t in range(T):
        g0 = input_ids[:, t, :] @ params["wih0"] + h0 @ params["whh0"] + params["b0"]
        h0, c0 = cell(g0, c0)
        g1 = h0 @ params["wih1"] + h1 @ params["whh1"] + params["b1"]
        h1, c1 = cell(g1, c1)
    return h1 @ params["wfc"] + params["bfc"]


if __name__ == "__main__":
    # Small shapes consistent with the module's forward:
    #   input_ids: (batch, seq, input_dim), output: (batch, output_dim)
    B, T, D, H, O = 2, 8, 64, 32, 8

    key = jax.random.PRNGKey(0)
    k_x, k_m, k_p = jax.random.split(key, 3)

    input_ids = jax.random.normal(k_x, (B, T, D), dtype=jnp.float32)
    attention_mask = jnp.ones((B, T), dtype=jnp.float32)  # unused, like PyTorch
    params = init_params(k_p, D, H, O)
    prepared = prepare_params(params)  # one-time weight prep (off the hot path)

    fwd = jax.jit(lstm_model_forward, static_argnames=("output_dim",))
    out = fwd(input_ids, attention_mask, prepared, output_dim=O)
    out = jax.block_until_ready(out)

    assert out.shape == (B, O) and out.dtype == jnp.float32

    ref = reference_forward(input_ids, params)
    max_err = float(jnp.max(jnp.abs(out - ref)))
    assert max_err < 1e-3, f"kernel/reference mismatch: {max_err}"

    print("KERNEL_OK")
</pallas_src>

<mosaic_0001>
module attributes {stable_mosaic.version = 11 : i64} {
  func.func @_lstm_fused_kernel(%arg0: memref<16x64xf32, #tpu.memory_space<vmem>>, %arg1: memref<64x256xf32, #tpu.memory_space<vmem>>, %arg2: memref<1x256xf32, #tpu.memory_space<vmem>>, %arg3: memref<1x256xf32, #tpu.memory_space<vmem>>, %arg4: memref<64x256xf32, #tpu.memory_space<vmem>>, %arg5: memref<64x128xf32, #tpu.memory_space<vmem>>, %arg6: memref<1x128xf32, #tpu.memory_space<vmem>>, %arg7: memref<2x128xf32, #tpu.memory_space<vmem>>) attributes {dimension_semantics = [], scalar_prefetch = 0 : i64, scratch_operands = 0 : i64, tpu.core_type = #tpu.core_type<tc>} {
    %c0 = arith.constant 0 : index
    %c0_0 = arith.constant 0 : index
    %0 = vector.load %arg0[%c0, %c0_0] : memref<16x64xf32, #tpu.memory_space<vmem>>, vector<16x64xf32>
    %c0_1 = arith.constant 0 : index
    %c0_2 = arith.constant 0 : index
    %1 = vector.load %arg1[%c0_1, %c0_2] : memref<64x256xf32, #tpu.memory_space<vmem>>, vector<64x256xf32>
    %cst = arith.constant dense<0.000000e+00> : vector<16x256xf32>
    %2 = tpu.matmul %0, %1, %cst {dimension_numbers = #tpu.dot_dimension_numbers<[1], [0], [0], [1], [0, 0, 1, 1], [], []>} : vector<16x64xf32>, vector<64x256xf32>, vector<16x256xf32> -> vector<16x256xf32>
    %c0_3 = arith.constant 0 : index
    %c0_4 = arith.constant 0 : index
    %3 = vector.load %arg2[%c0_3, %c0_4] : memref<1x256xf32, #tpu.memory_space<vmem>>, vector<1x256xf32>
    %4 = vector.broadcast %3 : vector<1x256xf32> to vector<16x256xf32>
    %5 = arith.addf %2, %4 : vector<16x256xf32>
    %c0_5 = arith.constant 0 : index
    %c0_6 = arith.constant 0 : index
    %6 = vector.load %arg4[%c0_5, %c0_6] : memref<64x256xf32, #tpu.memory_space<vmem>>, vector<64x256xf32>
    %c0_7 = arith.constant 0 : index
    %c0_8 = arith.constant 0 : index
    %7 = vector.load %arg3[%c0_7, %c0_8] : memref<1x256xf32, #tpu.memory_space<vmem>>, vector<1x256xf32>
    %8 = tpu.iota {dimensions = array<i32: 1>} : vector<2x256xi32>
    %c128_i32 = arith.constant 128 : i32
    %9 = vector.broadcast %c128_i32 : i32 to vector<2x256xi32>
    %10 = arith.cmpi sge, %8, %9 : vector<2x256xi32>
    %c192_i32 = arith.constant 192 : i32
    %11 = vector.broadcast %c192_i32 : i32 to vector<2x256xi32>
    %12 = arith.cmpi slt, %8, %11 : vector<2x256xi32>
    %13 = arith.andi %10, %12 : vector<2x256xi1>
    %cst_9 = arith.constant 0.000000e+00 : f32
    %14 = vector.broadcast %cst_9 : f32 to vector<2x64xf32>
    %15 = vector.extract_strided_slice %5 {offsets = [0, 0], sizes = [2, 256], strides = [1, 1]} : vector<16x256xf32> to vector<2x256xf32>
    %16 = arith.negf %15 : vector<2x256xf32>
    %17 = math.exp %16 : vector<2x256xf32>
    %cst_10 = arith.constant 1.000000e+00 : f32
    %18 = vector.broadcast %cst_10 : f32 to vector<2x256xf32>
    %19 = arith.addf %18, %17 : vector<2x256xf32>
    %20 = arith.divf %18, %19 : vector<2x256xf32>
    %cst_11 = arith.constant 2.000000e+00 : f32
    %21 = vector.broadcast %cst_11 : f32 to vector<2x256xf32>
    %22 = arith.mulf %21, %20 : vector<2x256xf32>
    %cst_12 = arith.constant 1.000000e+00 : f32
    %23 = vector.broadcast %cst_12 : f32 to vector<2x256xf32>
    %24 = arith.subf %22, %23 : vector<2x256xf32>
    %25 = arith.select %13, %24, %20 : vector<2x256xi1>, vector<2x256xf32>
    %26 = vector.extract_strided_slice %25 {offsets = [0, 0], sizes = [2, 64], strides = [1, 1]} : vector<2x256xf32> to vector<2x64xf32>
    %27 = vector.extract_strided_slice %25 {offsets = [0, 64], sizes = [2, 64], strides = [1, 1]} : vector<2x256xf32> to vector<2x64xf32>
    %28 = vector.extract_strided_slice %25 {offsets = [0, 128], sizes = [2, 64], strides = [1, 1]} : vector<2x256xf32> to vector<2x64xf32>
    %29 = vector.extract_strided_slice %25 {offsets = [0, 192], sizes = [2, 64], strides = [1, 1]} : vector<2x256xf32> to vector<2x64xf32>
    %30 = arith.mulf %27, %14 : vector<2x64xf32>
    %31 = arith.mulf %26, %28 : vector<2x64xf32>
    %32 = arith.addf %30, %31 : vector<2x64xf32>
    %33 = math.tanh %32 : vector<2x64xf32>
    %34 = arith.mulf %29, %33 : vector<2x64xf32>
    %cst_13 = arith.constant dense<0.000000e+00> : vector<2x256xf32>
    %35 = tpu.matmul %34, %6, %cst_13 {dimension_numbers = #tpu.dot_dimension_numbers<[1], [0], [0], [1], [0, 0, 1, 1], [], []>} : vector<2x64xf32>, vector<64x256xf32>, vector<2x256xf32> -> vector<2x256xf32>
    %36 = vector.extract_strided_slice %5 {offsets = [2, 0], sizes = [2, 256], strides = [1, 1]} : vector<16x256xf32> to vector<2x256xf32>
    %37 = arith.addf %35, %36 : vector<2x256xf32>
    %38 = vector.broadcast %7 : vector<1x256xf32> to vector<2x256xf32>
    %39 = arith.addf %37, %38 : vector<2x256xf32>
    %40 = arith.negf %39 : vector<2x256xf32>
    %41 = math.exp %40 : vector<2x256xf32>
    %cst_14 = arith.constant 1.000000e+00 : f32
    %42 = vector.broadcast %cst_14 : f32 to vector<2x256xf32>
    %43 = arith.addf %42, %41 : vector<2x256xf32>
    %44 = arith.divf %42, %43 : vector<2x256xf32>
    %cst_15 = arith.constant 2.000000e+00 : f32
    %45 = vector.broadcast %cst_15 : f32 to vector<2x256xf32>
    %46 = arith.mulf %45, %44 : vector<2x256xf32>
    %cst_16 = arith.constant 1.000000e+00 : f32
    %47 = vector.broadcast %cst_16 : f32 to vector<2x256xf32>
    %48 = arith.subf %46, %47 : vector<2x256xf32>
    %49 = arith.select %13, %48, %44 : vector<2x256xi1>, vector<2x256xf32>
    %50 = vector.extract_strided_slice %49 {offsets = [0, 0], sizes = [2, 64], strides = [1, 1]} : vector<2x256xf32> to vector<2x64xf32>
    %51 = vector.extract_strided_slice %49 {offsets = [0, 64], sizes = [2, 64], strides = [1, 1]} : vector<2x256xf32> to vector<2x64xf32>
    %52 = vector.extract_strided_slice %49 {offsets = [0, 128], sizes = [2, 64], strides = [1, 1]} : vector<2x256xf32> to vector<2x64xf32>
    %53 = vector.extract_strided_slice %49 {offsets = [0, 192], sizes = [2, 64], strides = [1, 1]} : vector<2x256xf32> to vector<2x64xf32>
    %54 = arith.mulf %51, %32 : vector<2x64xf32>
    %55 = arith.mulf %50, %52 : vector<2x64xf32>
    %56 = arith.addf %54, %55 : vector<2x64xf32>
    %57 = math.tanh %56 : vector<2x64xf32>
    %58 = arith.mulf %53, %57 : vector<2x64xf32>
    %cst_17 = arith.constant dense<0.000000e+00> : vector<2x256xf32>
    %59 = tpu.matmul %58, %6, %cst_17 {dimension_numbers = #tpu.dot_dimension_numbers<[1], [0], [0], [1], [0, 0, 1, 1], [], []>} : vector<2x64xf32>, vector<64x256xf32>, vector<2x256xf32> -> vector<2x256xf32>
    %60 = vector.extract_strided_slice %5 {offsets = [4, 0], sizes = [2, 256], strides = [1, 1]} : vector<16x256xf32> to vector<2x256xf32>
    %61 = arith.addf %59, %60 : vector<2x256xf32>
    %62 = vector.broadcast %7 : vector<1x256xf32> to vector<2x256xf32>
    %63 = arith.addf %61, %62 : vector<2x256xf32>
    %64 = arith.negf %63 : vector<2x256xf32>
    %65 = math.exp %64 : vector<2x256xf32>
    %cst_18 = arith.constant 1.000000e+00 : f32
    %66 = vector.broadcast %cst_18 : f32 to vector<2x256xf32>
    %67 = arith.addf %66, %65 : vector<2x256xf32>
    %68 = arith.divf %66, %67 : vector<2x256xf32>
    %cst_19 = arith.constant 2.000000e+00 : f32
    %69 = vector.broadcast %cst_19 : f32 to vector<2x256xf32>
    %70 = arith.mulf %69, %68 : vector<2x256xf32>
    %cst_20 = arith.constant 1.000000e+00 : f32
    %71 = vector.broadcast %cst_20 : f32 to vector<2x256xf32>
    %72 = arith.subf %70, %71 : vector<2x256xf32>
    %73 = arith.select %13, %72, %68 : vector<2x256xi1>, vector<2x256xf32>
    %74 = vector.extract_strided_slice %73 {offsets = [0, 0], sizes = [2, 64], strides = [1, 1]} : vector<2x256xf32> to vector<2x64xf32>
    %75 = vector.extract_strided_slice %73 {offsets = [0, 64], sizes = [2, 64], strides = [1, 1]} : vector<2x256xf32> to vector<2x64xf32>
    %76 = vector.extract_strided_slice %73 {offsets = [0, 128], sizes = [2, 64], strides = [1, 1]} : vector<2x256xf32> to vector<2x64xf32>
    %77 = vector.extract_strided_slice %73 {offsets = [0, 192], sizes = [2, 64], strides = [1, 1]} : vector<2x256xf32> to vector<2x64xf32>
    %78 = arith.mulf %75, %56 : vector<2x64xf32>
    %79 = arith.mulf %74, %76 : vector<2x64xf32>
    %80 = arith.addf %78, %79 : vector<2x64xf32>
    %81 = math.tanh %80 : vector<2x64xf32>
    %82 = arith.mulf %77, %81 : vector<2x64xf32>
    %cst_21 = arith.constant dense<0.000000e+00> : vector<2x256xf32>
    %83 = tpu.matmul %82, %6, %cst_21 {dimension_numbers = #tpu.dot_dimension_numbers<[1], [0], [0], [1], [0, 0, 1, 1], [], []>} : vector<2x64xf32>, vector<64x256xf32>, vector<2x256xf32> -> vector<2x256xf32>
    %84 = vector.extract_strided_slice %5 {offsets = [6, 0], sizes = [2, 256], strides = [1, 1]} : vector<16x256xf32> to vector<2x256xf32>
    %85 = arith.addf %83, %84 : vector<2x256xf32>
    %86 = vector.broadcast %7 : vector<1x256xf32> to vector<2x256xf32>
    %87 = arith.addf %85, %86 : vector<2x256xf32>
    %88 = arith.negf %87 : vector<2x256xf32>
    %89 = math.exp %88 : vector<2x256xf32>
    %cst_22 = arith.constant 1.000000e+00 : f32
    %90 = vector.broadcast %cst_22 : f32 to vector<2x256xf32>
    %91 = arith.addf %90, %89 : vector<2x256xf32>
    %92 = arith.divf %90, %91 : vector<2x256xf32>
    %cst_23 = arith.constant 2.000000e+00 : f32
    %93 = vector.broadcast %cst_23 : f32 to vector<2x256xf32>
    %94 = arith.mulf %93, %92 : vector<2x256xf32>
    %cst_24 = arith.constant 1.000000e+00 : f32
    %95 = vector.broadcast %cst_24 : f32 to vector<2x256xf32>
    %96 = arith.subf %94, %95 : vector<2x256xf32>
    %97 = arith.select %13, %96, %92 : vector<2x256xi1>, vector<2x256xf32>
    %98 = vector.extract_strided_slice %97 {offsets = [0, 0], sizes = [2, 64], strides = [1, 1]} : vector<2x256xf32> to vector<2x64xf32>
    %99 = vector.extract_strided_slice %97 {offsets = [0, 64], sizes = [2, 64], strides = [1, 1]} : vector<2x256xf32> to vector<2x64xf32>
    %100 = vector.extract_strided_slice %97 {offsets = [0, 128], sizes = [2, 64], strides = [1, 1]} : vector<2x256xf32> to vector<2x64xf32>
    %101 = vector.extract_strided_slice %97 {offsets = [0, 192], sizes = [2, 64], strides = [1, 1]} : vector<2x256xf32> to vector<2x64xf32>
    %102 = arith.mulf %99, %80 : vector<2x64xf32>
    %103 = arith.mulf %98, %100 : vector<2x64xf32>
    %104 = arith.addf %102, %103 : vector<2x64xf32>
    %105 = math.tanh %104 : vector<2x64xf32>
    %106 = arith.mulf %101, %105 : vector<2x64xf32>
    %cst_25 = arith.constant dense<0.000000e+00> : vector<2x256xf32>
    %107 = tpu.matmul %106, %6, %cst_25 {dimension_numbers = #tpu.dot_dimension_numbers<[1], [0], [0], [1], [0, 0, 1, 1], [], []>} : vector<2x64xf32>, vector<64x256xf32>, vector<2x256xf32> -> vector<2x256xf32>
    %108 = vector.extract_strided_slice %5 {offsets = [8, 0], sizes = [2, 256], strides = [1, 1]} : vector<16x256xf32> to vector<2x256xf32>
    %109 = arith.addf %107, %108 : vector<2x256xf32>
    %110 = vector.broadcast %7 : vector<1x256xf32> to vector<2x256xf32>
    %111 = arith.addf %109, %110 : vector<2x256xf32>
    %112 = arith.negf %111 : vector<2x256xf32>
    %113 = math.exp %112 : vector<2x256xf32>
    %cst_26 = arith.constant 1.000000e+00 : f32
    %114 = vector.broadcast %cst_26 : f32 to vector<2x256xf32>
    %115 = arith.addf %114, %113 : vector<2x256xf32>
    %116 = arith.divf %114, %115 : vector<2x256xf32>
    %cst_27 = arith.constant 2.000000e+00 : f32
    %117 = vector.broadcast %cst_27 : f32 to vector<2x256xf32>
    %118 = arith.mulf %117, %116 : vector<2x256xf32>
    %cst_28 = arith.constant 1.000000e+00 : f32
    %119 = vector.broadcast %cst_28 : f32 to vector<2x256xf32>
    %120 = arith.subf %118, %119 : vector<2x256xf32>
    %121 = arith.select %13, %120, %116 : vector<2x256xi1>, vector<2x256xf32>
    %122 = vector.extract_strided_slice %121 {offsets = [0, 0], sizes = [2, 64], strides = [1, 1]} : vector<2x256xf32> to vector<2x64xf32>
    %123 = vector.extract_strided_slice %121 {offsets = [0, 64], sizes = [2, 64], strides = [1, 1]} : vector<2x256xf32> to vector<2x64xf32>
    %124 = vector.extract_strided_slice %121 {offsets = [0, 128], sizes = [2, 64], strides = [1, 1]} : vector<2x256xf32> to vector<2x64xf32>
    %125 = vector.extract_strided_slice %121 {offsets = [0, 192], sizes = [2, 64], strides = [1, 1]} : vector<2x256xf32> to vector<2x64xf32>
    %126 = arith.mulf %123, %104 : vector<2x64xf32>
    %127 = arith.mulf %122, %124 : vector<2x64xf32>
    %128 = arith.addf %126, %127 : vector<2x64xf32>
    %129 = math.tanh %128 : vector<2x64xf32>
    %130 = arith.mulf %125, %129 : vector<2x64xf32>
    %cst_29 = arith.constant dense<0.000000e+00> : vector<2x256xf32>
    %131 = tpu.matmul %130, %6, %cst_29 {dimension_numbers = #tpu.dot_dimension_numbers<[1], [0], [0], [1], [0, 0, 1, 1], [], []>} : vector<2x64xf32>, vector<64x256xf32>, vector<2x256xf32> -> vector<2x256xf32>
    %132 = vector.extract_strided_slice %5 {offsets = [10, 0], sizes = [2, 256], strides = [1, 1]} : vector<16x256xf32> to vector<2x256xf32>
    %133 = arith.addf %131, %132 : vector<2x256xf32>
    %134 = vector.broadcast %7 : vector<1x256xf32> to vector<2x256xf32>
    %135 = arith.addf %133, %134 : vector<2x256xf32>
    %136 = arith.negf %135 : vector<2x256xf32>
    %137 = math.exp %136 : vector<2x256xf32>
    %cst_30 = arith.constant 1.000000e+00 : f32
    %138 = vector.broadcast %cst_30 : f32 to vector<2x256xf32>
    %139 = arith.addf %138, %137 : vector<2x256xf32>
    %140 = arith.divf %138, %139 : vector<2x256xf32>
    %cst_31 = arith.constant 2.000000e+00 : f32
    %141 = vector.broadcast %cst_31 : f32 to vector<2x256xf32>
    %142 = arith.mulf %141, %140 : vector<2x256xf32>
    %cst_32 = arith.constant 1.000000e+00 : f32
    %143 = vector.broadcast %cst_32 : f32 to vector<2x256xf32>
    %144 = arith.subf %142, %143 : vector<2x256xf32>
    %145 = arith.select %13, %144, %140 : vector<2x256xi1>, vector<2x256xf32>
    %146 = vector.extract_strided_slice %145 {offsets = [0, 0], sizes = [2, 64], strides = [1, 1]} : vector<2x256xf32> to vector<2x64xf32>
    %147 = vector.extract_strided_slice %145 {offsets = [0, 64], sizes = [2, 64], strides = [1, 1]} : vector<2x256xf32> to vector<2x64xf32>
    %148 = vector.extract_strided_slice %145 {offsets = [0, 128], sizes = [2, 64], strides = [1, 1]} : vector<2x256xf32> to vector<2x64xf32>
    %149 = vector.extract_strided_slice %145 {offsets = [0, 192], sizes = [2, 64], strides = [1, 1]} : vector<2x256xf32> to vector<2x64xf32>
    %150 = arith.mulf %147, %128 : vector<2x64xf32>
    %151 = arith.mulf %146, %148 : vector<2x64xf32>
    %152 = arith.addf %150, %151 : vector<2x64xf32>
    %153 = math.tanh %152 : vector<2x64xf32>
    %154 = arith.mulf %149, %153 : vector<2x64xf32>
    %cst_33 = arith.constant dense<0.000000e+00> : vector<2x256xf32>
    %155 = tpu.matmul %154, %6, %cst_33 {dimension_numbers = #tpu.dot_dimension_numbers<[1], [0], [0], [1], [0, 0, 1, 1], [], []>} : vector<2x64xf32>, vector<64x256xf32>, vector<2x256xf32> -> vector<2x256xf32>
    %156 = vector.extract_strided_slice %5 {offsets = [12, 0], sizes = [2, 256], strides = [1, 1]} : vector<16x256xf32> to vector<2x256xf32>
    %157 = arith.addf %155, %156 : vector<2x256xf32>
    %158 = vector.broadcast %7 : vector<1x256xf32> to vector<2x256xf32>
    %159 = arith.addf %157, %158 : vector<2x256xf32>
    %160 = arith.negf %159 : vector<2x256xf32>
    %161 = math.exp %160 : vector<2x256xf32>
    %cst_34 = arith.constant 1.000000e+00 : f32
    %162 = vector.broadcast %cst_34 : f32 to vector<2x256xf32>
    %163 = arith.addf %162, %161 : vector<2x256xf32>
    %164 = arith.divf %162, %163 : vector<2x256xf32>
    %cst_35 = arith.constant 2.000000e+00 : f32
    %165 = vector.broadcast %cst_35 : f32 to vector<2x256xf32>
    %166 = arith.mulf %165, %164 : vector<2x256xf32>
    %cst_36 = arith.constant 1.000000e+00 : f32
    %167 = vector.broadcast %cst_36 : f32 to vector<2x256xf32>
    %168 = arith.subf %166, %167 : vector<2x256xf32>
    %169 = arith.select %13, %168, %164 : vector<2x256xi1>, vector<2x256xf32>
    %170 = vector.extract_strided_slice %169 {offsets = [0, 0], sizes = [2, 64], strides = [1, 1]} : vector<2x256xf32> to vector<2x64xf32>
    %171 = vector.extract_strided_slice %169 {offsets = [0, 64], sizes = [2, 64], strides = [1, 1]} : vector<2x256xf32> to vector<2x64xf32>
    %172 = vector.extract_strided_slice %169 {offsets = [0, 128], sizes = [2, 64], strides = [1, 1]} : vector<2x256xf32> to vector<2x64xf32>
    %173 = vector.extract_strided_slice %169 {offsets = [0, 192], sizes = [2, 64], strides = [1, 1]} : vector<2x256xf32> to vector<2x64xf32>
    %174 = arith.mulf %171, %152 : vector<2x64xf32>
    %175 = arith.mulf %170, %172 : vector<2x64xf32>
    %176 = arith.addf %174, %175 : vector<2x64xf32>
    %177 = math.tanh %176 : vector<2x64xf32>
    %178 = arith.mulf %173, %177 : vector<2x64xf32>
    %cst_37 = arith.constant dense<0.000000e+00> : vector<2x256xf32>
    %179 = tpu.matmul %178, %6, %cst_37 {dimension_numbers = #tpu.dot_dimension_numbers<[1], [0], [0], [1], [0, 0, 1, 1], [], []>} : vector<2x64xf32>, vector<64x256xf32>, vector<2x256xf32> -> vector<2x256xf32>
    %180 = vector.extract_strided_slice %5 {offsets = [14, 0], sizes = [2, 256], strides = [1, 1]} : vector<16x256xf32> to vector<2x256xf32>
    %181 = arith.addf %179, %180 : vector<2x256xf32>
    %182 = vector.broadcast %7 : vector<1x256xf32> to vector<2x256xf32>
    %183 = arith.addf %181, %182 : vector<2x256xf32>
    %184 = arith.negf %183 : vector<2x256xf32>
    %185 = math.exp %184 : vector<2x256xf32>
    %cst_38 = arith.constant 1.000000e+00 : f32
    %186 = vector.broadcast %cst_38 : f32 to vector<2x256xf32>
    %187 = arith.addf %186, %185 : vector<2x256xf32>
    %188 = arith.divf %186, %187 : vector<2x256xf32>
    %cst_39 = arith.constant 2.000000e+00 : f32
    %189 = vector.broadcast %cst_39 : f32 to vector<2x256xf32>
    %190 = arith.mulf %189, %188 : vector<2x256xf32>
    %cst_40 = arith.constant 1.000000e+00 : f32
    %191 = vector.broadcast %cst_40 : f32 to vector<2x256xf32>
    %192 = arith.subf %190, %191 : vector<2x256xf32>
    %193 = arith.select %13, %192, %188 : vector<2x256xi1>, vector<2x256xf32>
    %194 = vector.extract_strided_slice %193 {offsets = [0, 0], sizes = [2, 64], strides = [1, 1]} : vector<2x256xf32> to vector<2x64xf32>
    %195 = vector.extract_strided_slice %193 {offsets = [0, 64], sizes = [2, 64], strides = [1, 1]} : vector<2x256xf32> to vector<2x64xf32>
    %196 = vector.extract_strided_slice %193 {offsets = [0, 128], sizes = [2, 64], strides = [1, 1]} : vector<2x256xf32> to vector<2x64xf32>
    %197 = vector.extract_strided_slice %193 {offsets = [0, 192], sizes = [2, 64], strides = [1, 1]} : vector<2x256xf32> to vector<2x64xf32>
    %198 = arith.mulf %195, %176 : vector<2x64xf32>
    %199 = arith.mulf %194, %196 : vector<2x64xf32>
    %200 = arith.addf %198, %199 : vector<2x64xf32>
    %201 = math.tanh %200 : vector<2x64xf32>
    %202 = arith.mulf %197, %201 : vector<2x64xf32>
    %cst_41 = arith.constant dense<0.000000e+00> : vector<2x256xf32>
    %203 = tpu.matmul %202, %6, %cst_41 {dimension_numbers = #tpu.dot_dimension_numbers<[1], [0], [0], [1], [0, 0, 1, 1], [], []>} : vector<2x64xf32>, vector<64x256xf32>, vector<2x256xf32> -> vector<2x256xf32>
    %204 = vector.broadcast %7 : vector<1x256xf32> to vector<2x256xf32>
    %205 = arith.addf %203, %204 : vector<2x256xf32>
    %206 = arith.negf %205 : vector<2x256xf32>
    %207 = math.exp %206 : vector<2x256xf32>
    %cst_42 = arith.constant 1.000000e+00 : f32
    %208 = vector.broadcast %cst_42 : f32 to vector<2x256xf32>
    %209 = arith.addf %208, %207 : vector<2x256xf32>
    %210 = arith.divf %208, %209 : vector<2x256xf32>
    %cst_43 = arith.constant 2.000000e+00 : f32
    %211 = vector.broadcast %cst_43 : f32 to vector<2x256xf32>
    %212 = arith.mulf %211, %210 : vector<2x256xf32>
    %cst_44 = arith.constant 1.000000e+00 : f32
    %213 = vector.broadcast %cst_44 : f32 to vector<2x256xf32>
    %214 = arith.subf %212, %213 : vector<2x256xf32>
    %215 = arith.select %13, %214, %210 : vector<2x256xi1>, vector<2x256xf32>
    %216 = vector.extract_strided_slice %215 {offsets = [0, 0], sizes = [2, 64], strides = [1, 1]} : vector<2x256xf32> to vector<2x64xf32>
    %217 = vector.extract_strided_slice %215 {offsets = [0, 64], sizes = [2, 64], strides = [1, 1]} : vector<2x256xf32> to vector<2x64xf32>
    %218 = vector.extract_strided_slice %215 {offsets = [0, 128], sizes = [2, 64], strides = [1, 1]} : vector<2x256xf32> to vector<2x64xf32>
    %219 = vector.extract_strided_slice %215 {offsets = [0, 192], sizes = [2, 64], strides = [1, 1]} : vector<2x256xf32> to vector<2x64xf32>
    %220 = arith.mulf %217, %200 : vector<2x64xf32>
    %221 = arith.mulf %216, %218 : vector<2x64xf32>
    %222 = arith.addf %220, %221 : vector<2x64xf32>
    %223 = math.tanh %222 : vector<2x64xf32>
    %224 = arith.mulf %219, %223 : vector<2x64xf32>
    %c0_45 = arith.constant 0 : index
    %c0_46 = arith.constant 0 : index
    %225 = vector.load %arg5[%c0_45, %c0_46] : memref<64x128xf32, #tpu.memory_space<vmem>>, vector<64x128xf32>
    %cst_47 = arith.constant dense<0.000000e+00> : vector<2x128xf32>
    %226 = tpu.matmul %224, %225, %cst_47 {dimension_numbers = #tpu.dot_dimension_numbers<[1], [0], [0], [1], [0, 0, 1, 1], [], []>} : vector<2x64xf32>, vector<64x128xf32>, vector<2x128xf32> -> vector<2x128xf32>
    %c0_48 = arith.constant 0 : index
    %c0_49 = arith.constant 0 : index
    %227 = vector.load %arg6[%c0_48, %c0_49] : memref<1x128xf32, #tpu.memory_space<vmem>>, vector<1x128xf32>
    %228 = vector.broadcast %227 : vector<1x128xf32> to vector<2x128xf32>
    %229 = arith.addf %226, %228 : vector<2x128xf32>
    %c0_50 = arith.constant 0 : index
    %c0_51 = arith.constant 0 : index
    %230 = vector.load %arg7[%c0_50, %c0_51] : memref<2x128xf32, #tpu.memory_space<vmem>>, vector<2x128xf32>
    tpu.vector_store %arg7[%c0_50, %c0_51], %229 {strides = array<i32>} : memref<2x128xf32, #tpu.memory_space<vmem>>, vector<2x128xf32>,
    return
  }
}

</mosaic_0001>

<bundles_post_ra>
// kernel: lstm_model_forward.1
= control target key start
LH: loop header
LB: loop body
LE: loop exit
PB: predicated region body
PF: predicated region fallthrough
CT: control target
= control target key end

     0   :  { %12 = vsyncpa [#allocation3], 0  ;;  %s1758_s0 = inlined_call_operand.vmem [shape: f32[16,64], index: 0, kind: input, shape index: {}]   ;;  %s1759_s1 = inlined_call_operand.hbm [shape: f32[64,256], index: 1, kind: input, shape index: {}]   ;;  %s1760_s2 = inlined_call_operand.vmem [shape: f32[1,256], index: 2, kind: input, shape index: {}]   ;;  %s1761_s3 = inlined_call_operand.vmem [shape: f32[1,256], index: 3, kind: input, shape index: {}]   ;;  %s1762_s4 = inlined_call_operand.hbm [shape: f32[64,256], index: 4, kind: input, shape index: {}]   ;;  %s1763_s5 = inlined_call_operand.hbm [shape: f32[64,128], index: 5, kind: input, shape index: {}]   ;;  %s1764_s6 = inlined_call_operand.vmem [shape: f32[1,128], index: 6, kind: input, shape index: {}]   ;;  %s1765_s7 = inlined_call_operand.hbm [shape: f32[2,128], index: 7, kind: output, shape index: {}]  }
   0x1   :  { %13 = vsyncpa [#allocation6], 0 }
   0x2   :  { %14 = vsyncpa [#allocation4], 0  ;;  %s38_s26 = sshll.u32 %s1762_s4, 4  ;;  %s1376_s27 = smov [#allocation5]   ;;  %s39_s26 = int_to_ptr.hbm [resolvable:$true] %s38_s26 }
   0x3   :  { %s40_s28 = sshll.u32 %s1376_s27, 4  ;;  %s21_s8 = sshll.u32 %s1759_s1, 4  ;;  %s41_s28 = int_to_ptr.vmem [resolvable:$true] %s40_s28  ;;  %s22_s8 = int_to_ptr.hbm [resolvable:$true] %s21_s8 }
   0x4   :  { %s1377_s9 = smov 256   ;;  %s1378_s10 = smov 16  }
   0x5   :  { %46 = dma.hbm_to_vmem [thread:$0]  %s39_s26, 2048, %s41_s28, [#allocation6], %s1377_s9, %s1377_s9, %s1378_s10  }
   0x6   :  { %s1379_s11 = smov [#allocation2]   ;;  %s51_s15 = sshll.u32 %s1763_s5, 4  ;;  %s52_s15 = int_to_ptr.hbm [resolvable:$true] %s51_s15 }
   0x7   :  { %s23_s12 = sshll.u32 %s1379_s11, 4  ;;  %s1380_s4 = smov [#allocation7]   ;;  %s24_s12 = int_to_ptr.vmem [resolvable:$true] %s23_s12 }
   0x8   :  { %29 = dma.hbm_to_vmem [thread:$0]  %s22_s8, 2048, %s24_s12, [#allocation3], %s1377_s9, %s1377_s9, %s1378_s10  }
   0x9   :  { %s53_s16 = sshll.u32 %s1380_s4, 4  ;;  %s1381_s17 = smov 128   ;;  %s54_s16 = int_to_ptr.vmem [resolvable:$true] %s53_s16 }
   0xa   :  { %s1382_s18 = smov 8  }
   0xb   :  { %59 = dma.hbm_to_vmem [thread:$0]  %s52_s15, 1024, %s54_s16, [#allocation6], %s1381_s17, %s1381_s17, %s1382_s18  }
   0xc   :  { %1370 = dma.done.wait [#allocation3], 2048  }
   0xd   :  { %1371 = vsyncadd [#allocation3], 4294965248 }
   0xe   :  { %1372 = dma.done.wait [#allocation6], 3072  }
   0xf   :  { %1373 = vsyncadd [#allocation6], 4294964224  ;;  %v90_v0 = vld [vmem:[#allocation2 + $0x70] sm:$0xff]  ;;  %v91_v1 = vld [vmem:[#allocation2 + $0x78] sm:$0xff]  ;;  %vm98_vm0 = vcmask 523264   ;;  %v168_v32 = vlaneseq  ;;  %s1384_s25 = smov [#allocation8]  }
  0x10   :  { %v88_v2 = vld [vmem:[#allocation2 + $0x60] sm:$0xff]  ;;  %113 = vmatpush.msra.mxu0 %v90_v0  ;;  %136 = vmatpush.msra.mxu1 %v91_v1  ;;  %v89_v3 = vld [vmem:[#allocation2 + $0x68] sm:$0xff]  ;;  %v86_v4 = vld [vmem:[#allocation2 + $0x50] sm:$0xff]  ;;  %s1104_s26 = sshll.u32 %s1384_s25, 4  ;;  %s1106_s29 = sshll.u32 %s1765_s7, 4  ;;  %s1105_s26 = int_to_ptr.vmem [resolvable:$true] %s1104_s26  ;;  %s1107_s29 = int_to_ptr.hbm [resolvable:$true] %s1106_s29 }
  0x11   :  { %v87_v5 = vld [vmem:[#allocation2 + $0x58] sm:$0xff]  ;;  %v84_v6 = vld [vmem:[#allocation2 + $0x40] sm:$0xff]  ;;  %v85_v7 = vld [vmem:[#allocation2 + $0x48] sm:$0xff]  ;;  %v169_v37 = vand.u32 127, %v168_v32 }
  0x12   :  { %114 = vmatpush.msra.mxu0 %v88_v2  ;;  %137 = vmatpush.msra.mxu1 %v89_v3  ;;  %v82_v8 = vld [vmem:[#allocation2 + $0x30] sm:$0xff]  ;;  %v83_v9 = vld [vmem:[#allocation2 + $0x38] sm:$0xff]  ;;  %v80_v10 = vld [vmem:[#allocation2 + $0x20] sm:$0xff] }
  0x13   :  { %v81_v11 = vld [vmem:[#allocation2 + $0x28] sm:$0xff]  ;;  %v78_v12 = vld [vmem:[#allocation2 + $0x10] sm:$0xff]  ;;  %v79_v13 = vld [vmem:[#allocation2 + $0x18] sm:$0xff]  ;;  %v1456_v43 = vadd.s32 128, %v169_v37 }
  0x14   :  { %115 = vmatpush.msra.mxu0 %v86_v4  ;;  %138 = vmatpush.msra.mxu1 %v87_v5  ;;  %v76_v14 = vld [vmem:[#allocation2] sm:$0xff]  ;;  %v77_v15 = vld [vmem:[#allocation2 + $0x8] sm:$0xff]  ;;  %v1465_v57 = vld [vmem:[#allocation5 + $0x70] sm:$0xff] }
  0x15   :  { %v74_v16 = vld [vmem:[%s1758_s0] sm:$0xff]  ;;  %vm174_vm8 = vcmp.lt.s32.totalorder %v1456_v43, 192  ;;  %v1467_v58 = vld [vmem:[#allocation5 + $0x78] sm:$0xff]  ;;  %249 = vmatpush.msra.mxu2 %v1465_v57  ;;  %v1473_v60 = vld [vmem:[#allocation5 + $0x68] sm:$0xff] }
  0x16   :  { %116 = vmatpush.msra.mxu0 %v84_v6  ;;  %139 = vmatpush.msra.mxu1 %v85_v7  ;;  %v1442_v17 = vld [vmem:[%s1760_s2] sm:$0x3]  ;;  %s1383_s2 = smov 64   ;;  %v1475_v61 = vld [vmem:[#allocation5 + $0x50] sm:$0xff]  ;;  %v1477_v62 = vld [vmem:[#allocation5 + $0x58] sm:$0xff] }
  0x17   :  { %v94_v18 = vperm.slane %v1442_v17, 0  ;;  %v95_v19 = vperm.slane %v1442_v17, 1  ;;  %v1469_v59 = vld [vmem:[#allocation5 + $0x60] sm:$0xff]  ;;  %269 = vmatpush.msra.mxu3 %v1467_v58  ;;  %v1485_v0 = vld [vmem:[#allocation5 + $0x48] sm:$0xff]  ;;  %v1491_v1 = vld [vmem:[#allocation5 + $0x30] sm:$0xff] }
  0x18   :  { %117 = vmatpush.msra.mxu0 %v82_v8  ;;  %140 = vmatpush.msra.mxu1 %v83_v9  ;;  %v1483_v63 = vld [vmem:[#allocation5 + $0x40] sm:$0xff]  ;;  %v1493_v2 = vld [vmem:[#allocation5 + $0x38] sm:$0xff]  ;;  %v1501_v4 = vld [vmem:[#allocation5 + $0x28] sm:$0xff] }
  0x19   :  { %250 = vmatpush.msra.mxu2 %v1469_v59  ;;  %270 = vmatpush.msra.mxu3 %v1473_v60  ;;  %v1499_v3 = vld [vmem:[#allocation5 + $0x20] sm:$0xff]  ;;  %v1507_v5 = vld [vmem:[#allocation5 + $0x10] sm:$0xff]  ;;  %v1509_v6 = vld [vmem:[#allocation5 + $0x18] sm:$0xff] }
  0x1a   :  { %118 = vmatpush.msra.mxu0 %v80_v10  ;;  %141 = vmatpush.msra.mxu1 %v81_v11  ;;  %v1515_v7 = vld [vmem:[#allocation5] sm:$0xff]  ;;  %v1517_v8 = vld [vmem:[#allocation5 + $0x8] sm:$0xff] }
  0x1b   :  { %251 = vmatpush.msra.mxu2 %v1475_v61  ;;  %271 = vmatpush.msra.mxu3 %v1477_v62 }
  0x1c   :  { %119 = vmatpush.msra.mxu0 %v78_v12  ;;  %142 = vmatpush.msra.mxu1 %v79_v13 }
  0x1d   :  { %252 = vmatpush.msra.mxu2 %v1483_v63  ;;  %272 = vmatpush.msra.mxu3 %v1485_v0 }
  0x1e   :  { %120 = vmatpush.msra.mxu0 %v76_v14  ;;  %143 = vmatpush.msra.mxu1 %v77_v15  ;;  %v167_v15 = vld [vmem:[%s1761_s3] sm:$0x3] }
  0x1f   :  { %1117 = vmatmul.msk.f32.vlgmr.msra.gmra.mxu0 %vm98_vm0, %v74_v16  ;;  %1119 = vmatmul.msk.f32.vlgmr.msra.gmra.mxu1 %vm98_vm0, %v74_v16 }
  0x20   :  { %378 = vmatpush.msrb.mxu1 %v1467_v58  ;;  %358 = vmatpush.msrb.mxu0 %v1465_v57 }
  0x21   :  { %253 = vmatpush.msra.mxu2 %v1491_v1  ;;  %273 = vmatpush.msra.mxu3 %v1493_v2 }
  0x22   :  { %379 = vmatpush.msrb.mxu1 %v1473_v60  ;;  %359 = vmatpush.msrb.mxu0 %v1469_v59 }
  0x23   :  { %254 = vmatpush.msra.mxu2 %v1499_v3  ;;  %274 = vmatpush.msra.mxu3 %v1501_v4 }
  0x24   :  { %380 = vmatpush.msrb.mxu1 %v1477_v62  ;;  %360 = vmatpush.msrb.mxu0 %v1475_v61 }
  0x25   :  { %255 = vmatpush.msra.mxu2 %v1507_v5  ;;  %275 = vmatpush.msra.mxu3 %v1509_v6 }
  0x26   :  { %381 = vmatpush.msrb.mxu1 %v1485_v0  ;;  %361 = vmatpush.msrb.mxu0 %v1483_v63 }
  0x27   :  { %256 = vmatpush.msra.mxu2 %v1515_v7  ;;  %276 = vmatpush.msra.mxu3 %v1517_v8 }
  0x28   :  { %382 = vmatpush.msrb.mxu1 %v1493_v2  ;;  %362 = vmatpush.msrb.mxu0 %v1491_v1 }
  0x29   :  { %462 = vmatpush.msrb.mxu2 %v1465_v57  ;;  %482 = vmatpush.msrb.mxu3 %v1467_v58 }
  0x2a   :  { %383 = vmatpush.msrb.mxu1 %v1501_v4  ;;  %363 = vmatpush.msrb.mxu0 %v1499_v3 }
  0x2b   :  { %463 = vmatpush.msrb.mxu2 %v1469_v59  ;;  %483 = vmatpush.msrb.mxu3 %v1473_v60 }
  0x2c   :  { %384 = vmatpush.msrb.mxu1 %v1509_v6  ;;  %364 = vmatpush.msrb.mxu0 %v1507_v5 }
  0x2d   :  { %464 = vmatpush.msrb.mxu2 %v1475_v61  ;;  %484 = vmatpush.msrb.mxu3 %v1477_v62 }
  0x2e   :  { %385 = vmatpush.msrb.mxu1 %v1517_v8  ;;  %365 = vmatpush.msrb.mxu0 %v1515_v7 }
  0x2f   :  { %465 = vmatpush.msrb.mxu2 %v1483_v63  ;;  %485 = vmatpush.msrb.mxu3 %v1485_v0 }
  0x30   :  { %562 = vmatpush.msra.mxu0 %v1465_v57  ;;  %582 = vmatpush.msra.mxu1 %v1467_v58 }
  0x31   :  { %466 = vmatpush.msrb.mxu2 %v1491_v1  ;;  %486 = vmatpush.msrb.mxu3 %v1493_v2 }
  0x32   :  { %563 = vmatpush.msra.mxu0 %v1469_v59  ;;  %583 = vmatpush.msra.mxu1 %v1473_v60 }
  0x33   :  { %467 = vmatpush.msrb.mxu2 %v1499_v3  ;;  %487 = vmatpush.msrb.mxu3 %v1501_v4 }
  0x34   :  { %564 = vmatpush.msra.mxu0 %v1475_v61  ;;  %584 = vmatpush.msra.mxu1 %v1477_v62 }
  0x35   :  { %468 = vmatpush.msrb.mxu2 %v1507_v5  ;;  %488 = vmatpush.msrb.mxu3 %v1509_v6 }
  0x36   :  { %565 = vmatpush.msra.mxu0 %v1483_v63  ;;  %585 = vmatpush.msra.mxu1 %v1485_v0 }
  0x37   :  { %469 = vmatpush.msrb.mxu2 %v1515_v7  ;;  %489 = vmatpush.msrb.mxu3 %v1517_v8 }
  0x38   :  { %566 = vmatpush.msra.mxu0 %v1491_v1  ;;  %586 = vmatpush.msra.mxu1 %v1493_v2 }
  0x3a   :  { %567 = vmatpush.msra.mxu0 %v1499_v3  ;;  %587 = vmatpush.msra.mxu1 %v1501_v4 }
  0x3c   :  { %568 = vmatpush.msra.mxu0 %v1507_v5  ;;  %588 = vmatpush.msra.mxu1 %v1509_v6 }
  0x3e   :  { %569 = vmatpush.msra.mxu0 %v1515_v7  ;;  %589 = vmatpush.msra.mxu1 %v1517_v8 }
  0x9c   :  { %v122_v20 = vpop.f32.mrf.mxu0  ;;  %v145_v21 = vpop.f32.mrf.mxu1 }
  0x9d   :  { %v1448_v22 = vadd.f32 %v122_v20, %v94_v18  ;;  %v1452_v23 = vadd.f32 %v145_v21, %v95_v19  ;;  %v1588_v20 = vperm.slane %v167_v15, 0 }
  0x9f   :  { %v1121_v24 = vmul.f32 -1.442695, %v1448_v22  ;;  %v1122_v25 = vmul.f32 -1.442695, %v1452_v23  ;;  %v235_v16 = vrot.slane %v1448_v22, 2  ;;  %v236_v21 = vrot.slane %v1452_v23, 2 }
  0xa1   :  { %1184 = vpow2.f32 %v1121_v24  ;;  %v1591_v24 = vperm.slane %v167_v15, 1  ;;  %v75_v15 = vld [vmem:[%s1758_s0 + $0x8] sm:$0xff] }
  0xa2   :  { %1186 = vpow2.f32 %v1122_v25  ;;  %1118 = vmatmul.msk.f32.gmra.mxu0 %vm98_vm0, %v75_v15  ;;  %1120 = vmatmul.msk.f32.gmra.mxu1 %vm98_vm0, %v75_v15 }
  0xa7   :  { %v1185_v26 = vpop.eup %1184 }
  0xa8   :  { %v1187_v27 = vpop.eup %1186  ;;  %v183_v28 = vadd.f32 1.0, %v1185_v26 }
  0xa9   :  { %v184_v29 = vadd.f32 1.0, %v1187_v27 }
  0xaa   :  { %1188 = vrcp.f32 %v183_v28  ;;  %v196_v46 = vand.u32 2147483648, %v183_v28  ;;  %vm190_vm6 = vweird.f32 %v183_v28  ;;  %v194_v48 = vand.u32 2147483647, %v183_v28 }
  0xab   :  { %1190 = vrcp.f32 %v184_v29  ;;  %v211_v39 = vand.u32 2147483648, %v184_v29  ;;  %v209_v41 = vand.u32 2147483647, %v184_v29  ;;  %vm205_vm2 = vweird.f32 %v184_v29 }
  0xac   :  { %v197_v52 = vor.u32 1.1754944e-38, %v196_v46  ;;  %vm195_vm9 = vcmp.eq.f32.partialorder %v194_v48, 8.507059e+37 }
  0xad   :  { %v212_v45 = vor.u32 1.1754944e-38, %v211_v39  ;;  %vm210_vm5 = vcmp.eq.f32.partialorder %v209_v41, 8.507059e+37 }
  0xb0   :  { %v1189_v30 = vpop.eup %1188 }
  0xb1   :  { %v1191_v31 = vpop.eup %1190  ;;  %v186_v33 = vmul.f32 %v1189_v30, %v183_v28  ;;  %vm191_vm3 = vweird.f32 %v1189_v30 }
  0xb2   :  { %v201_v34 = vmul.f32 %v1191_v31, %v184_v29  ;;  %vm206_vm1 = vweird.f32 %v1191_v31  ;;  %vm192_vm7 = vmor %vm190_vm6, %vm191_vm3 }
  0xb3   :  { %v187_v35 = vsub.f32 1.0, %v186_v33  ;;  %vm207_vm4 = vmor %vm205_vm2, %vm206_vm1 }
  0xb4   :  { %v202_v36 = vsub.f32 1.0, %v201_v34 }
  0xb5   :  { %v188_v38 = vmul.f32 %v1189_v30, %v187_v35 }
  0xb6   :  { %v203_v40 = vmul.f32 %v1191_v31, %v202_v36 }
  0xb7   :  { %v189_v44 = vadd.f32 %v1189_v30, %v188_v38 }
  0xb8   :  { %v204_v42 = vadd.f32 %v1191_v31, %v203_v40 }
  0xb9   :  { %v193_v51 = vsel %vm192_vm7, %v1189_v30, %v189_v44 }
  0xba   :  { %v208_v47 = vsel %vm207_vm4, %v1191_v31, %v204_v42  ;;  %v198_v54 = vsel %vm195_vm9, %v197_v52, %v193_v51 }
  0xbb   :  { %v213_v49 = vsel %vm210_vm5, %v212_v45, %v208_v47  ;;  %v221_v9 = vmul.f32 0.0, %v198_v54 }
  0xbc   :  { %v216_v50 = vmul.f32 2.0, %v213_v49 }
  0xbe   :  { %v1124_v53 = vadd.f32 -1.0, %v216_v50 }
  0xc0   :  { %v1461_v55 = vsel %vm174_vm8, %v1124_v53, %v213_v49 }
  0xc1   :  { %v222_v56 = vmul.f32 %v1461_v55, %v198_v54 }
  0xc3   :  { %224 = vrot.lane.b32.xlu0 %v222_v56, %s1383_s2 }
 0x135   :  { %v225_v10 = vpop.permute.xlu0 %224 }
 0x136   :  { %v1537_v11 = vadd.f32 %v225_v10, %v221_v9 }
 0x138   :  { %1192 = vtanh.f32 %v1537_v11 }
 0x13e   :  { %v1193_v12 = vpop.eup %1192 }
 0x13f   :  { %v229_v13 = vmul.f32 %v1193_v12, %v1461_v55 }
 0x141   :  { %231 = vrot.lane.b32.xlu0 %v229_v13, %s1383_s2 }
 0x1b3   :  { %v232_v14 = vpop.permute.xlu0 %231 }
 0x1b4   :  { %1125 = vmatmul.msk.f32.vlgmr.msra.gmra.mxu2 %vm98_vm0, %v232_v14  ;;  %1126 = vmatmul.msk.f32.vlgmr.msra.gmra.mxu3 %vm98_vm0, %v232_v14 }
 0x1b5   :  { %668 = vmatpush.msra.mxu2 %v1465_v57  ;;  %688 = vmatpush.msra.mxu3 %v1467_v58 }
 0x1b7   :  { %669 = vmatpush.msra.mxu2 %v1469_v59  ;;  %689 = vmatpush.msra.mxu3 %v1473_v60 }
 0x1b9   :  { %670 = vmatpush.msra.mxu2 %v1475_v61  ;;  %690 = vmatpush.msra.mxu3 %v1477_v62 }
 0x1bb   :  { %671 = vmatpush.msra.mxu2 %v1483_v63  ;;  %691 = vmatpush.msra.mxu3 %v1485_v0 }
 0x1bd   :  { %672 = vmatpush.msra.mxu2 %v1491_v1  ;;  %692 = vmatpush.msra.mxu3 %v1493_v2 }
 0x1bf   :  { %673 = vmatpush.msra.mxu2 %v1499_v3  ;;  %693 = vmatpush.msra.mxu3 %v1501_v4 }
 0x1c1   :  { %674 = vmatpush.msra.mxu2 %v1507_v5  ;;  %694 = vmatpush.msra.mxu3 %v1509_v6 }
 0x1c3   :  { %675 = vmatpush.msra.mxu2 %v1515_v7  ;;  %695 = vmatpush.msra.mxu3 %v1517_v8 }
 0x237   :  { %v258_v25 = vpop.f32.mrf.mxu2  ;;  %v278_v26 = vpop.f32.mrf.mxu3 }
 0x238   :  { %v259_v27 = vadd.f32 %v258_v25, %v235_v16  ;;  %v279_v28 = vadd.f32 %v278_v26, %v236_v21 }
 0x23a   :  { %v286_v29 = vadd.f32 %v1588_v20, %v259_v27  ;;  %v287_v30 = vadd.f32 %v1591_v24, %v279_v28 }
 0x23c   :  { %v1127_v31 = vmul.f32 -1.442695, %v286_v29  ;;  %v1128_v32 = vmul.f32 -1.442695, %v287_v30  ;;  %v1628_v29 = vpop.f32.mrf.mxu1  ;;  %v344_v30 = vrot.slane %v1448_v22, 4 }
 0x23e   :  { %1194 = vpow2.f32 %v1127_v31  ;;  %v345_v31 = vrot.slane %v1452_v23, 4 }
 0x23f   :  { %1196 = vpow2.f32 %v1128_v32 }
 0x244   :  { %v1195_v33 = vpop.eup %1194 }
 0x245   :  { %v1197_v34 = vpop.eup %1196  ;;  %v294_v35 = vadd.f32 1.0, %v1195_v33 }
 0x246   :  { %v295_v36 = vadd.f32 1.0, %v1197_v34 }
 0x247   :  { %1198 = vrcp.f32 %v294_v35  ;;  %v307_v51 = vand.u32 2147483648, %v294_v35  ;;  %vm301_vm15 = vweird.f32 %v294_v35  ;;  %v305_v53 = vand.u32 2147483647, %v294_v35 }
 0x248   :  { %1200 = vrcp.f32 %v295_v36  ;;  %v322_v45 = vand.u32 2147483648, %v295_v36  ;;  %v320_v47 = vand.u32 2147483647, %v295_v36  ;;  %vm316_vm11 = vweird.f32 %v295_v36 }
 0x249   :  { %v308_v9 = vor.u32 1.1754944e-38, %v307_v51  ;;  %vm306_vm2 = vcmp.eq.f32.partialorder %v305_v53, 8.507059e+37 }
 0x24a   :  { %v323_v50 = vor.u32 1.1754944e-38, %v322_v45  ;;  %vm321_vm14 = vcmp.eq.f32.partialorder %v320_v47, 8.507059e+37 }
 0x24d   :  { %v1199_v37 = vpop.eup %1198 }
 0x24e   :  { %v1201_v38 = vpop.eup %1200  ;;  %v297_v39 = vmul.f32 %v1199_v37, %v294_v35  ;;  %vm302_vm12 = vweird.f32 %v1199_v37 }
 0x24f   :  { %v312_v40 = vmul.f32 %v1201_v38, %v295_v36  ;;  %vm317_vm10 = vweird.f32 %v1201_v38  ;;  %vm303_vm1 = vmor %vm301_vm15, %vm302_vm12 }
 0x250   :  { %v298_v41 = vsub.f32 1.0, %v297_v39  ;;  %vm318_vm13 = vmor %vm316_vm11, %vm317_vm10 }
 0x251   :  { %v313_v42 = vsub.f32 1.0, %v312_v40 }
 0x252   :  { %v299_v44 = vmul.f32 %v1199_v37, %v298_v41 }
 0x253   :  { %v314_v46 = vmul.f32 %v1201_v38, %v313_v42 }
 0x254   :  { %v300_v49 = vadd.f32 %v1199_v37, %v299_v44 }
 0x255   :  { %v315_v48 = vadd.f32 %v1201_v38, %v314_v46 }
 0x256   :  { %v304_v56 = vsel %vm303_vm1, %v1199_v37, %v300_v49 }
 0x257   :  { %v319_v52 = vsel %vm318_vm13, %v1201_v38, %v315_v48  ;;  %v309_v12 = vsel %vm306_vm2, %v308_v9, %v304_v56 }
 0x258   :  { %v324_v54 = vsel %vm321_vm14, %v323_v50, %v319_v52  ;;  %v332_v16 = vmul.f32 %v309_v12, %v1537_v11  ;;  %v1626_v11 = vpop.f32.mrf.mxu0 }
 0x259   :  { %v327_v55 = vmul.f32 2.0, %v324_v54 }
 0x25b   :  { %v1130_v10 = vadd.f32 -1.0, %v327_v55 }
 0x25d   :  { %v331_v13 = vsel %vm174_vm8, %v1130_v10, %v324_v54 }
 0x25e   :  { %v333_v14 = vmul.f32 %v331_v13, %v309_v12 }
 0x260   :  { %335 = vrot.lane.b32.xlu1 %v333_v14, %s1383_s2 }
 0x2d2   :  { %v336_v21 = vpop.permute.xlu1 %335 }
 0x2d3   :  { %v1604_v25 = vadd.f32 %v336_v21, %v332_v16 }
 0x2d5   :  { %1202 = vtanh.f32 %v1604_v25 }
 0x2db   :  { %v1203_v26 = vpop.eup %1202 }
 0x2dc   :  { %v340_v27 = vmul.f32 %v1203_v26, %v331_v13 }
 0x2de   :  { %342 = vrot.lane.b32.xlu1 %v340_v27, %s1383_s2 }
 0x350   :  { %v343_v28 = vpop.permute.xlu1 %342 }
 0x351   :  { %1131 = vmatmul.msk.f32.vlgmr.msrb.gmra.mxu0 %vm98_vm0, %v343_v28  ;;  %1132 = vmatmul.msk.f32.vlgmr.msrb.gmra.mxu1 %vm98_vm0, %v343_v28 }
 0x352   :  { %772 = vmatpush.msrb.mxu0 %v1465_v57  ;;  %792 = vmatpush.msrb.mxu1 %v1467_v58 }
 0x354   :  { %773 = vmatpush.msrb.mxu0 %v1469_v59  ;;  %793 = vmatpush.msrb.mxu1 %v1473_v60 }
 0x356   :  { %774 = vmatpush.msrb.mxu0 %v1475_v61  ;;  %794 = vmatpush.msrb.mxu1 %v1477_v62 }
 0x358   :  { %775 = vmatpush.msrb.mxu0 %v1483_v63  ;;  %795 = vmatpush.msrb.mxu1 %v1485_v0 }
 0x35a   :  { %776 = vmatpush.msrb.mxu0 %v1491_v1  ;;  %796 = vmatpush.msrb.mxu1 %v1493_v2 }
 0x35c   :  { %777 = vmatpush.msrb.mxu0 %v1499_v3  ;;  %797 = vmatpush.msrb.mxu1 %v1501_v4 }
 0x35e   :  { %778 = vmatpush.msrb.mxu0 %v1507_v5  ;;  %798 = vmatpush.msrb.mxu1 %v1509_v6 }
 0x360   :  { %779 = vmatpush.msrb.mxu0 %v1515_v7  ;;  %799 = vmatpush.msrb.mxu1 %v1517_v8 }
 0x3ce   :  { %v367_v32 = vpop.f32.mrf.mxu0  ;;  %v387_v33 = vpop.f32.mrf.mxu1 }
 0x3cf   :  { %v368_v34 = vadd.f32 %v367_v32, %v344_v30  ;;  %v388_v35 = vadd.f32 %v387_v33, %v345_v31 }
 0x3d1   :  { %v390_v36 = vadd.f32 %v368_v34, %v1588_v20  ;;  %v391_v37 = vadd.f32 %v388_v35, %v1591_v24 }
 0x3d3   :  { %v1133_v38 = vmul.f32 -1.442695, %v390_v36  ;;  %v1134_v39 = vmul.f32 -1.442695, %v391_v37  ;;  %v449_v37 = vrot.slane %v1452_v23, 6 }
 0x3d5   :  { %1204 = vpow2.f32 %v1133_v38 }
 0x3d6   :  { %1206 = vpow2.f32 %v1134_v39 }
 0x3db   :  { %v1205_v40 = vpop.eup %1204 }
 0x3dc   :  { %v1207_v41 = vpop.eup %1206  ;;  %v398_v42 = vadd.f32 1.0, %v1205_v40 }
 0x3dd   :  { %v399_v44 = vadd.f32 1.0, %v1207_v41 }
 0x3de   :  { %1208 = vrcp.f32 %v398_v42  ;;  %v411_v10 = vand.u32 2147483648, %v398_v42  ;;  %vm405_vm9 = vweird.f32 %v398_v42  ;;  %v409_v13 = vand.u32 2147483647, %v398_v42 }
 0x3df   :  { %1210 = vrcp.f32 %v399_v44  ;;  %v426_v52 = vand.u32 2147483648, %v399_v44  ;;  %v424_v54 = vand.u32 2147483647, %v399_v44  ;;  %vm420_vm4 = vweird.f32 %v399_v44 }
 0x3e0   :  { %v412_v21 = vor.u32 1.1754944e-38, %v411_v10  ;;  %vm410_vm11 = vcmp.eq.f32.partialorder %v409_v13, 8.507059e+37 }
 0x3e1   :  { %v427_v9 = vor.u32 1.1754944e-38, %v426_v52  ;;  %vm425_vm7 = vcmp.eq.f32.partialorder %v424_v54, 8.507059e+37 }
 0x3e4   :  { %v1209_v45 = vpop.eup %1208 }
 0x3e5   :  { %v1211_v46 = vpop.eup %1210  ;;  %v401_v47 = vmul.f32 %v1209_v45, %v398_v42  ;;  %vm406_vm5 = vweird.f32 %v1209_v45 }
 0x3e6   :  { %v416_v48 = vmul.f32 %v1211_v46, %v399_v44  ;;  %vm421_vm3 = vweird.f32 %v1211_v46  ;;  %vm407_vm10 = vmor %vm405_vm9, %vm406_vm5 }
 0x3e7   :  { %v402_v49 = vsub.f32 1.0, %v401_v47  ;;  %vm422_vm6 = vmor %vm420_vm4, %vm421_vm3 }
 0x3e8   :  { %v417_v50 = vsub.f32 1.0, %v416_v48 }
 0x3e9   :  { %v403_v51 = vmul.f32 %v1209_v45, %v402_v49 }
 0x3ea   :  { %v418_v53 = vmul.f32 %v1211_v46, %v417_v50 }
 0x3eb   :  { %v404_v56 = vadd.f32 %v1209_v45, %v403_v51 }
 0x3ec   :  { %v419_v55 = vadd.f32 %v1211_v46, %v418_v53 }
 0x3ed   :  { %v408_v16 = vsel %vm407_vm10, %v1209_v45, %v404_v56 }
 0x3ee   :  { %v423_v12 = vsel %vm422_vm6, %v1211_v46, %v419_v55  ;;  %v413_v27 = vsel %vm410_vm11, %v412_v21, %v408_v16 }
 0x3ef   :  { %v428_v14 = vsel %vm425_vm7, %v427_v9, %v423_v12  ;;  %v436_v31 = vmul.f32 %v413_v27, %v1604_v25  ;;  %v448_v25 = vrot.slane %v1448_v22, 6 }
 0x3f0   :  { %v431_v15 = vmul.f32 2.0, %v428_v14 }
 0x3f2   :  { %v1136_v26 = vadd.f32 -1.0, %v431_v15 }
 0x3f4   :  { %v435_v28 = vsel %vm174_vm8, %v1136_v26, %v428_v14 }
 0x3f5   :  { %v437_v30 = vmul.f32 %v435_v28, %v413_v27 }
 0x3f7   :  { %439 = vrot.lane.b32.xlu2 %v437_v30, %s1383_s2 }
 0x451   :  { %v440_v32 = vpop.permute.xlu2 %439 }
 0x452   :  { %v1638_v33 = vadd.f32 %v440_v32, %v436_v31 }
 0x454   :  { %1212 = vtanh.f32 %v1638_v33 }
 0x45a   :  { %v1213_v34 = vpop.eup %1212 }
 0x45b   :  { %v444_v35 = vmul.f32 %v1213_v34, %v435_v28 }
 0x45d   :  { %446 = vrot.lane.b32.xlu2 %v444_v35, %s1383_s2 }
 0x4b7   :  { %v447_v36 = vpop.permute.xlu2 %446 }
 0x4b8   :  { %1137 = vmatmul.msk.f32.vlgmr.msrb.gmra.mxu2 %vm98_vm0, %v447_v36  ;;  %1138 = vmatmul.msk.f32.vlgmr.msrb.gmra.mxu3 %vm98_vm0, %v447_v36 }
 0x4b9   :  { %876 = vmatpush.msrb.mxu2 %v1465_v57  ;;  %896 = vmatpush.msrb.mxu3 %v1467_v58 }
 0x4bb   :  { %877 = vmatpush.msrb.mxu2 %v1469_v59  ;;  %897 = vmatpush.msrb.mxu3 %v1473_v60 }
 0x4bd   :  { %878 = vmatpush.msrb.mxu2 %v1475_v61  ;;  %898 = vmatpush.msrb.mxu3 %v1477_v62 }
 0x4bf   :  { %879 = vmatpush.msrb.mxu2 %v1483_v63  ;;  %899 = vmatpush.msrb.mxu3 %v1485_v0 }
 0x4c1   :  { %880 = vmatpush.msrb.mxu2 %v1491_v1  ;;  %900 = vmatpush.msrb.mxu3 %v1493_v2 }
 0x4c3   :  { %881 = vmatpush.msrb.mxu2 %v1499_v3  ;;  %901 = vmatpush.msrb.mxu3 %v1501_v4 }
 0x4c5   :  { %882 = vmatpush.msrb.mxu2 %v1507_v5  ;;  %902 = vmatpush.msrb.mxu3 %v1509_v6 }
 0x4c7   :  { %883 = vmatpush.msrb.mxu2 %v1515_v7  ;;  %903 = vmatpush.msrb.mxu3 %v1517_v8 }
 0x53b   :  { %v471_v38 = vpop.f32.mrf.mxu2  ;;  %v491_v39 = vpop.f32.mrf.mxu3 }
 0x53c   :  { %v472_v40 = vadd.f32 %v471_v38, %v448_v25  ;;  %v492_v41 = vadd.f32 %v491_v39, %v449_v37 }
 0x53e   :  { %v494_v42 = vadd.f32 %v472_v40, %v1588_v20  ;;  %v495_v44 = vadd.f32 %v492_v41, %v1591_v24 }
 0x540   :  { %v1139_v45 = vmul.f32 -1.442695, %v494_v42  ;;  %v1140_v46 = vmul.f32 -1.442695, %v495_v44 }
 0x542   :  { %1214 = vpow2.f32 %v1139_v45 }
 0x543   :  { %1216 = vpow2.f32 %v1140_v46 }
 0x548   :  { %v1215_v47 = vpop.eup %1214 }
 0x549   :  { %v1217_v48 = vpop.eup %1216  ;;  %v502_v49 = vadd.f32 1.0, %v1215_v47 }
 0x54a   :  { %v503_v50 = vadd.f32 1.0, %v1217_v48 }
 0x54b   :  { %1218 = vrcp.f32 %v502_v49  ;;  %v515_v15 = vand.u32 2147483648, %v502_v49  ;;  %vm509_vm2 = vweird.f32 %v502_v49  ;;  %v513_v21 = vand.u32 2147483647, %v502_v49 }
 0x54c   :  { %1220 = vrcp.f32 %v503_v50  ;;  %v530_v56 = vand.u32 2147483648, %v503_v50  ;;  %v528_v10 = vand.u32 2147483647, %v503_v50  ;;  %vm524_vm13 = vweird.f32 %v503_v50 }
 0x54d   :  { %v516_v30 = vor.u32 1.1754944e-38, %v515_v15  ;;  %vm514_vm4 = vcmp.eq.f32.partialorder %v513_v21, 8.507059e+37 }
 0x54e   :  { %v531_v14 = vor.u32 1.1754944e-38, %v530_v56  ;;  %vm529_vm1 = vcmp.eq.f32.partialorder %v528_v10, 8.507059e+37 }
 0x551   :  { %v1219_v22 = vpop.eup %1218 }
 0x552   :  { %v1221_v23 = vpop.eup %1220  ;;  %v505_v51 = vmul.f32 %v1219_v22, %v502_v49  ;;  %vm510_vm14 = vweird.f32 %v1219_v22 }
 0x553   :  { %v520_v52 = vmul.f32 %v1221_v23, %v503_v50  ;;  %vm525_vm12 = vweird.f32 %v1221_v23  ;;  %vm511_vm3 = vmor %vm509_vm2, %vm510_vm14 }
 0x554   :  { %v506_v53 = vsub.f32 1.0, %v505_v51  ;;  %vm526_vm15 = vmor %vm524_vm13, %vm525_vm12 }
 0x555   :  { %v521_v54 = vsub.f32 1.0, %v520_v52 }
 0x556   :  { %v507_v55 = vmul.f32 %v1219_v22, %v506_v53 }
 0x557   :  { %v522_v9 = vmul.f32 %v1221_v23, %v521_v54 }
 0x558   :  { %v508_v13 = vadd.f32 %v1219_v22, %v507_v55 }
 0x559   :  { %v523_v12 = vadd.f32 %v1221_v23, %v522_v9 }
 0x55a   :  { %v512_v28 = vsel %vm511_vm3, %v1219_v22, %v508_v13 }
 0x55b   :  { %v527_v16 = vsel %vm526_vm15, %v1221_v23, %v523_v12  ;;  %v517_v32 = vsel %vm514_vm4, %v516_v30, %v512_v28 }
 0x55c   :  { %v532_v26 = vsel %vm529_vm1, %v531_v14, %v527_v16  ;;  %v540_v36 = vmul.f32 %v517_v32, %v1638_v33 }
 0x55d   :  { %v535_v27 = vmul.f32 2.0, %v532_v26 }
 0x55f   :  { %v1142_v31 = vadd.f32 -1.0, %v535_v27 }
 0x561   :  { %v539_v34 = vsel %vm174_vm8, %v1142_v31, %v532_v26 }
 0x562   :  { %v541_v35 = vmul.f32 %v539_v34, %v517_v32 }
 0x564   :  { %543 = vrot.lane.b32.xlu0 %v541_v35, %s1383_s2 }
 0x5d6   :  { %v544_v25 = vpop.permute.xlu0 %543 }
 0x5d7   :  { %v1668_v37 = vadd.f32 %v544_v25, %v540_v36 }
 0x5d9   :  { %1222 = vtanh.f32 %v1668_v37 }
 0x5df   :  { %v1223_v38 = vpop.eup %1222 }
 0x5e0   :  { %v548_v39 = vmul.f32 %v1223_v38, %v539_v34 }
 0x5e2   :  { %550 = vrot.lane.b32.xlu1 %v548_v39, %s1383_s2 }
 0x654   :  { %v551_v40 = vpop.permute.xlu1 %550 }
 0x655   :  { %1143 = vmatmul.msk.f32.vlgmr.msra.gmra.mxu0 %vm98_vm0, %v551_v40  ;;  %1144 = vmatmul.msk.f32.vlgmr.msra.gmra.mxu1 %vm98_vm0, %v551_v40 }
 0x656   :  { %976 = vmatpush.msra.mxu0 %v1465_v57  ;;  %996 = vmatpush.msra.mxu1 %v1467_v58  ;;  %v1693_v57 = vadd.f32 %v1626_v11, %v94_v18  ;;  %v1698_v58 = vadd.f32 %v1628_v29, %v95_v19 }
 0x658   :  { %977 = vmatpush.msra.mxu0 %v1469_v59  ;;  %997 = vmatpush.msra.mxu1 %v1473_v60  ;;  %v654_v15 = vrot.slane %v1693_v57, 2  ;;  %v655_v16 = vrot.slane %v1698_v58, 2 }
 0x65a   :  { %978 = vmatpush.msra.mxu0 %v1475_v61  ;;  %998 = vmatpush.msra.mxu1 %v1477_v62 }
 0x65c   :  { %979 = vmatpush.msra.mxu0 %v1483_v63  ;;  %999 = vmatpush.msra.mxu1 %v1485_v0 }
 0x65e   :  { %980 = vmatpush.msra.mxu0 %v1491_v1  ;;  %1000 = vmatpush.msra.mxu1 %v1493_v2 }
 0x660   :  { %981 = vmatpush.msra.mxu0 %v1499_v3  ;;  %1001 = vmatpush.msra.mxu1 %v1501_v4 }
 0x662   :  { %982 = vmatpush.msra.mxu0 %v1507_v5  ;;  %1002 = vmatpush.msra.mxu1 %v1509_v6 }
 0x664   :  { %983 = vmatpush.msra.mxu0 %v1515_v7  ;;  %1003 = vmatpush.msra.mxu1 %v1517_v8 }
 0x6d2   :  { %v571_v59 = vpop.f32.mrf.mxu0  ;;  %v591_v60 = vpop.f32.mrf.mxu1 }
 0x6d3   :  { %v572_v61 = vadd.f32 %v571_v59, %v1693_v57  ;;  %v592_v62 = vadd.f32 %v591_v60, %v1698_v58 }
 0x6d5   :  { %v594_v63 = vadd.f32 %v572_v61, %v1588_v20  ;;  %v595_v0 = vadd.f32 %v592_v62, %v1591_v24 }
 0x6d7   :  { %v1145_v1 = vmul.f32 -1.442695, %v594_v63  ;;  %v1146_v2 = vmul.f32 -1.442695, %v595_v0 }
 0x6d9   :  { %1224 = vpow2.f32 %v1145_v1 }
 0x6da   :  { %1226 = vpow2.f32 %v1146_v2 }
 0x6df   :  { %v1225_v18 = vpop.eup %1224 }
 0x6e0   :  { %v1227_v3 = vpop.eup %1226  ;;  %v602_v17 = vadd.f32 1.0, %v1225_v18 }
 0x6e1   :  { %v603_v4 = vadd.f32 1.0, %v1227_v3 }
 0x6e2   :  { %1228 = vrcp.f32 %v602_v17  ;;  %v615_v47 = vand.u32 2147483648, %v602_v17  ;;  %vm609_vm11 = vweird.f32 %v602_v17  ;;  %v613_v49 = vand.u32 2147483647, %v602_v17 }
 0x6e3   :  { %1230 = vrcp.f32 %v603_v4  ;;  %v630_v33 = vand.u32 2147483648, %v603_v4  ;;  %v628_v42 = vand.u32 2147483647, %v603_v4  ;;  %vm624_vm6 = vweird.f32 %v603_v4 }
 0x6e4   :  { %v616_v51 = vor.u32 1.1754944e-38, %v615_v47  ;;  %vm614_vm13 = vcmp.eq.f32.partialorder %v613_v49, 8.507059e+37  ;;  %v758_v49 = vrot.slane %v1693_v57, 4 }
 0x6e5   :  { %v631_v46 = vor.u32 1.1754944e-38, %v630_v33  ;;  %vm629_vm10 = vcmp.eq.f32.partialorder %v628_v42, 8.507059e+37 }
 0x6e8   :  { %v1229_v19 = vpop.eup %1228 }
 0x6e9   :  { %v1231_v5 = vpop.eup %1230  ;;  %v605_v6 = vmul.f32 %v1229_v19, %v602_v17  ;;  %vm610_vm7 = vweird.f32 %v1229_v19 }
 0x6ea   :  { %v620_v7 = vmul.f32 %v1231_v5, %v603_v4  ;;  %vm625_vm5 = vweird.f32 %v1231_v5  ;;  %vm611_vm12 = vmor %vm609_vm11, %vm610_vm7 }
 0x6eb   :  { %v606_v8 = vsub.f32 1.0, %v605_v6  ;;  %vm626_vm9 = vmor %vm624_vm6, %vm625_vm5 }
 0x6ec   :  { %v621_v11 = vsub.f32 1.0, %v620_v7 }
 0x6ed   :  { %v607_v29 = vmul.f32 %v1229_v19, %v606_v8 }
 0x6ee   :  { %v622_v41 = vmul.f32 %v1231_v5, %v621_v11 }
 0x6ef   :  { %v608_v45 = vadd.f32 %v1229_v19, %v607_v29 }
 0x6f0   :  { %v623_v44 = vadd.f32 %v1231_v5, %v622_v41 }
 0x6f1   :  { %v612_v23 = vsel %vm611_vm12, %v1229_v19, %v608_v45 }
 0x6f2   :  { %v627_v48 = vsel %vm626_vm9, %v1231_v5, %v623_v44  ;;  %v617_v53 = vsel %vm614_vm13, %v616_v51, %v612_v23 }
 0x6f3   :  { %v632_v50 = vsel %vm629_vm10, %v631_v46, %v627_v48  ;;  %v640_v56 = vmul.f32 %v617_v53, %v1668_v37 }
 0x6f4   :  { %v635_v22 = vmul.f32 2.0, %v632_v50 }
 0x6f6   :  { %v1148_v52 = vadd.f32 -1.0, %v635_v22 }
 0x6f8   :  { %v639_v54 = vsel %vm174_vm8, %v1148_v52, %v632_v50  ;;  %v759_v50 = vrot.slane %v1698_v58, 4 }
 0x6f9   :  { %v641_v55 = vmul.f32 %v639_v54, %v617_v53 }
 0x6fb   :  { %643 = vrot.lane.b32.xlu2 %v641_v55, %s1383_s2 }
 0x755   :  { %v644_v9 = vpop.permute.xlu2 %643 }
 0x756   :  { %v646_v10 = vadd.f32 %v644_v9, %v640_v56 }
 0x758   :  { %1232 = vtanh.f32 %v646_v10 }
 0x75e   :  { %v1233_v12 = vpop.eup %1232 }
 0x75f   :  { %v648_v13 = vmul.f32 %v1233_v12, %v639_v54 }
 0x761   :  { %650 = vrot.lane.b32.xlu0 %v648_v13, %s1383_s2 }
 0x7d3   :  { %v651_v14 = vpop.permute.xlu0 %650 }
 0x7d4   :  { %1149 = vmatmul.msk.f32.vlgmr.msra.gmra.mxu2 %vm98_vm0, %v651_v14  ;;  %1150 = vmatmul.msk.f32.vlgmr.msra.gmra.mxu3 %vm98_vm0, %v651_v14 }
 0x857   :  { %v677_v21 = vpop.f32.mrf.mxu2  ;;  %v697_v26 = vpop.f32.mrf.mxu3 }
 0x858   :  { %v678_v27 = vadd.f32 %v677_v21, %v654_v15  ;;  %v698_v28 = vadd.f32 %v697_v26, %v655_v16 }
 0x85a   :  { %v700_v30 = vadd.f32 %v678_v27, %v1588_v20  ;;  %v701_v31 = vadd.f32 %v698_v28, %v1591_v24 }
 0x85c   :  { %v1151_v32 = vmul.f32 -1.442695, %v700_v30  ;;  %v1152_v34 = vmul.f32 -1.442695, %v701_v31 }
 0x85e   :  { %1234 = vpow2.f32 %v1151_v32 }
 0x85f   :  { %1236 = vpow2.f32 %v1152_v34 }
 0x864   :  { %v1235_v35 = vpop.eup %1234 }
 0x865   :  { %v1237_v36 = vpop.eup %1236  ;;  %v708_v25 = vadd.f32 1.0, %v1235_v35 }
 0x866   :  { %v709_v37 = vadd.f32 1.0, %v1237_v36 }
 0x867   :  { %1238 = vrcp.f32 %v708_v25  ;;  %v721_v17 = vand.u32 2147483648, %v708_v25  ;;  %vm715_vm4 = vweird.f32 %v708_v25  ;;  %v719_v19 = vand.u32 2147483647, %v708_v25 }
 0x868   :  { %1240 = vrcp.f32 %v709_v37  ;;  %v736_v63 = vand.u32 2147483648, %v709_v37  ;;  %v734_v1 = vand.u32 2147483647, %v709_v37  ;;  %vm730_vm15 = vweird.f32 %v709_v37 }
 0x869   :  { %v722_v8 = vor.u32 1.1754944e-38, %v721_v17  ;;  %vm720_vm6 = vcmp.eq.f32.partialorder %v719_v19, 8.507059e+37  ;;  %v862_v19 = vrot.slane %v1693_v57, 6 }
 0x86a   :  { %v737_v3 = vor.u32 1.1754944e-38, %v736_v63  ;;  %vm735_vm3 = vcmp.eq.f32.partialorder %v734_v1, 8.507059e+37 }
 0x86d   :  { %v1239_v38 = vpop.eup %1238 }
 0x86e   :  { %v1241_v39 = vpop.eup %1240  ;;  %v711_v40 = vmul.f32 %v1239_v38, %v708_v25  ;;  %vm716_vm1 = vweird.f32 %v1239_v38 }
 0x86f   :  { %v726_v59 = vmul.f32 %v1241_v39, %v709_v37  ;;  %vm731_vm14 = vweird.f32 %v1241_v39  ;;  %vm717_vm5 = vmor %vm715_vm4, %vm716_vm1 }
 0x870   :  { %v712_v60 = vsub.f32 1.0, %v711_v40  ;;  %vm732_vm2 = vmor %vm730_vm15, %vm731_vm14 }
 0x871   :  { %v727_v61 = vsub.f32 1.0, %v726_v59 }
 0x872   :  { %v713_v62 = vmul.f32 %v1239_v38, %v712_v60 }
 0x873   :  { %v728_v0 = vmul.f32 %v1241_v39, %v727_v61 }
 0x874   :  { %v714_v18 = vadd.f32 %v1239_v38, %v713_v62 }
 0x875   :  { %v729_v2 = vadd.f32 %v1241_v39, %v728_v0 }
 0x876   :  { %v718_v7 = vsel %vm717_vm5, %v1239_v38, %v714_v18 }
 0x877   :  { %v733_v4 = vsel %vm732_vm2, %v1241_v39, %v729_v2  ;;  %v723_v29 = vsel %vm720_vm6, %v722_v8, %v718_v7 }
 0x878   :  { %v738_v5 = vsel %vm735_vm3, %v737_v3, %v733_v4  ;;  %v746_v42 = vmul.f32 %v723_v29, %v646_v10 }
 0x879   :  { %v741_v6 = vmul.f32 2.0, %v738_v5 }
 0x87b   :  { %v1154_v11 = vadd.f32 -1.0, %v741_v6 }
 0x87d   :  { %v745_v33 = vsel %vm174_vm8, %v1154_v11, %v738_v5  ;;  %v863_v5 = vrot.slane %v1698_v58, 6 }
 0x87e   :  { %v747_v41 = vmul.f32 %v745_v33, %v723_v29 }
 0x880   :  { %749 = vrot.lane.b32.xlu1 %v747_v41, %s1383_s2 }
 0x8f2   :  { %v750_v44 = vpop.permute.xlu1 %749 }
 0x8f3   :  { %v752_v45 = vadd.f32 %v750_v44, %v746_v42 }
 0x8f5   :  { %1242 = vtanh.f32 %v752_v45 }
 0x8fb   :  { %v1243_v46 = vpop.eup %1242 }
 0x8fc   :  { %v754_v47 = vmul.f32 %v1243_v46, %v745_v33 }
 0x8fe   :  { %756 = vrot.lane.b32.xlu2 %v754_v47, %s1383_s2 }
 0x958   :  { %v757_v48 = vpop.permute.xlu2 %756 }
 0x959   :  { %1155 = vmatmul.msk.f32.vlgmr.msrb.gmra.mxu0 %vm98_vm0, %v757_v48  ;;  %1156 = vmatmul.msk.f32.vlgmr.msrb.gmra.mxu1 %vm98_vm0, %v757_v48 }
 0x9d6   :  { %v781_v22 = vpop.f32.mrf.mxu0  ;;  %v801_v23 = vpop.f32.mrf.mxu1 }
 0x9d7   :  { %v782_v51 = vadd.f32 %v781_v22, %v758_v49  ;;  %v802_v52 = vadd.f32 %v801_v23, %v759_v50 }
 0x9d9   :  { %v804_v53 = vadd.f32 %v782_v51, %v1588_v20  ;;  %v805_v54 = vadd.f32 %v802_v52, %v1591_v24 }
 0x9db   :  { %v1157_v55 = vmul.f32 -1.442695, %v804_v53  ;;  %v1158_v56 = vmul.f32 -1.442695, %v805_v54 }
 0x9dd   :  { %1244 = vpow2.f32 %v1157_v55 }
 0x9de   :  { %1246 = vpow2.f32 %v1158_v56 }
 0x9e3   :  { %v1245_v9 = vpop.eup %1244 }
 0x9e4   :  { %v1247_v10 = vpop.eup %1246  ;;  %v812_v12 = vadd.f32 1.0, %v1245_v9 }
 0x9e5   :  { %v813_v13 = vadd.f32 1.0, %v1247_v10 }
 0x9e6   :  { %1248 = vrcp.f32 %v812_v12  ;;  %v825_v25 = vand.u32 2147483648, %v812_v12  ;;  %vm819_vm13 = vweird.f32 %v812_v12  ;;  %v823_v38 = vand.u32 2147483647, %v812_v12 }
 0x9e7   :  { %1250 = vrcp.f32 %v813_v13  ;;  %v840_v30 = vand.u32 2147483648, %v813_v13  ;;  %v838_v32 = vand.u32 2147483647, %v813_v13  ;;  %vm834_vm9 = vweird.f32 %v813_v13 }
 0x9e8   :  { %v826_v60 = vor.u32 1.1754944e-38, %v825_v25  ;;  %vm824_vm15 = vcmp.eq.f32.partialorder %v823_v38, 8.507059e+37 }
 0x9e9   :  { %v841_v36 = vor.u32 1.1754944e-38, %v840_v30  ;;  %vm839_vm12 = vcmp.eq.f32.partialorder %v838_v32, 8.507059e+37 }
 0x9ec   :  { %v1249_v14 = vpop.eup %1248 }
 0x9ed   :  { %v1251_v15 = vpop.eup %1250  ;;  %v815_v16 = vmul.f32 %v1249_v14, %v812_v12  ;;  %vm820_vm10 = vweird.f32 %v1249_v14 }
 0x9ee   :  { %v830_v21 = vmul.f32 %v1251_v15, %v813_v13  ;;  %vm835_vm7 = vweird.f32 %v1251_v15  ;;  %vm821_vm14 = vmor %vm819_vm13, %vm820_vm10 }
 0x9ef   :  { %v816_v26 = vsub.f32 1.0, %v815_v16  ;;  %vm836_vm11 = vmor %vm834_vm9, %vm835_vm7 }
 0x9f0   :  { %v831_v27 = vsub.f32 1.0, %v830_v21 }
 0x9f1   :  { %v817_v28 = vmul.f32 %v1249_v14, %v816_v26 }
 0x9f2   :  { %v832_v31 = vmul.f32 %v1251_v15, %v831_v27 }
 0x9f3   :  { %v818_v35 = vadd.f32 %v1249_v14, %v817_v28 }
 0x9f4   :  { %v833_v34 = vadd.f32 %v1251_v15, %v832_v31 }
 0x9f5   :  { %v822_v59 = vsel %vm821_vm14, %v1249_v14, %v818_v35 }
 0x9f6   :  { %v837_v37 = vsel %vm836_vm11, %v1251_v15, %v833_v34  ;;  %v827_v62 = vsel %vm824_vm15, %v826_v60, %v822_v59 }
 0x9f7   :  { %v842_v39 = vsel %vm839_vm12, %v841_v36, %v837_v37  ;;  %v850_v1 = vmul.f32 %v827_v62, %v752_v45 }
 0x9f8   :  { %v845_v40 = vmul.f32 2.0, %v842_v39 }
 0x9fa   :  { %v1160_v61 = vadd.f32 -1.0, %v845_v40 }
 0x9fc   :  { %v849_v63 = vsel %vm174_vm8, %v1160_v61, %v842_v39 }
 0x9fd   :  { %v851_v0 = vmul.f32 %v849_v63, %v827_v62 }
 0x9ff   :  { %853 = vrot.lane.b32.xlu0 %v851_v0, %s1383_s2 }
 0xa71   :  { %v854_v2 = vpop.permute.xlu0 %853 }
 0xa72   :  { %v856_v18 = vadd.f32 %v854_v2, %v850_v1 }
 0xa74   :  { %1252 = vtanh.f32 %v856_v18 }
 0xa7a   :  { %v1253_v3 = vpop.eup %1252 }
 0xa7b   :  { %v858_v17 = vmul.f32 %v1253_v3, %v849_v63 }
 0xa7d   :  { %860 = vrot.lane.b32.xlu1 %v858_v17, %s1383_s2 }
 0xaef   :  { %v861_v4 = vpop.permute.xlu1 %860 }
 0xaf0   :  { %1161 = vmatmul.msk.f32.vlgmr.msrb.gmra.mxu2 %vm98_vm0, %v861_v4  ;;  %1162 = vmatmul.msk.f32.vlgmr.msrb.gmra.mxu3 %vm98_vm0, %v861_v4 }
 0xb73   :  { %v885_v6 = vpop.f32.mrf.mxu2  ;;  %v905_v7 = vpop.f32.mrf.mxu3 }
 0xb74   :  { %v886_v8 = vadd.f32 %v885_v6, %v862_v19  ;;  %v906_v11 = vadd.f32 %v905_v7, %v863_v5 }
 0xb76   :  { %v908_v29 = vadd.f32 %v886_v8, %v1588_v20  ;;  %v909_v33 = vadd.f32 %v906_v11, %v1591_v24 }
 0xb78   :  { %v1163_v41 = vmul.f32 -1.442695, %v908_v29  ;;  %v1164_v42 = vmul.f32 -1.442695, %v909_v33 }
 0xb7a   :  { %1254 = vpow2.f32 %v1163_v41 }
 0xb7b   :  { %1256 = vpow2.f32 %v1164_v42 }
 0xb80   :  { %v1255_v44 = vpop.eup %1254 }
 0xb81   :  { %v1257_v45 = vpop.eup %1256  ;;  %v916_v46 = vadd.f32 1.0, %v1255_v44 }
 0xb82   :  { %v917_v47 = vadd.f32 1.0, %v1257_v45 }
 0xb83   :  { %1258 = vrcp.f32 %v916_v46  ;;  %v929_v9 = vand.u32 2147483648, %v916_v46  ;;  %vm923_vm6 = vweird.f32 %v916_v46  ;;  %v927_v12 = vand.u32 2147483647, %v916_v46 }
 0xb84   :  { %1260 = vrcp.f32 %v917_v47  ;;  %v944_v51 = vand.u32 2147483648, %v917_v47  ;;  %v942_v53 = vand.u32 2147483647, %v917_v47  ;;  %vm938_vm2 = vweird.f32 %v917_v47 }
 0xb85   :  { %v930_v16 = vor.u32 1.1754944e-38, %v929_v9  ;;  %vm928_vm9 = vcmp.eq.f32.partialorder %v927_v12, 8.507059e+37 }
 0xb86   :  { %v945_v56 = vor.u32 1.1754944e-38, %v944_v51  ;;  %vm943_vm5 = vcmp.eq.f32.partialorder %v942_v53, 8.507059e+37  ;;  %v1062_v51 = vld [vmem:[#allocation7 + $0x8] sm:$0xff] }
 0xb89   :  { %v1259_v57 = vpop.eup %1258 }
 0xb8a   :  { %v1261_v58 = vpop.eup %1260  ;;  %v919_v48 = vmul.f32 %v1259_v57, %v916_v46  ;;  %vm924_vm3 = vweird.f32 %v1259_v57 }
 0xb8b   :  { %v934_v49 = vmul.f32 %v1261_v58, %v917_v47  ;;  %vm939_vm1 = vweird.f32 %v1261_v58  ;;  %vm925_vm7 = vmor %vm923_vm6, %vm924_vm3 }
 0xb8c   :  { %v920_v50 = vsub.f32 1.0, %v919_v48  ;;  %vm940_vm4 = vmor %vm938_vm2, %vm939_vm1  ;;  %v1067_v48 = vld [vmem:[#allocation7 + $0x30] sm:$0xff] }
 0xb8d   :  { %v935_v22 = vsub.f32 1.0, %v934_v49  ;;  %v1066_v49 = vld [vmem:[#allocation7 + $0x28] sm:$0xff] }
 0xb8e   :  { %v921_v23 = vmul.f32 %v1259_v57, %v920_v50  ;;  %v1065_v50 = vld [vmem:[#allocation7 + $0x20] sm:$0xff] }
 0xb8f   :  { %v936_v52 = vmul.f32 %v1261_v58, %v935_v22  ;;  %v1064_v22 = vld [vmem:[#allocation7 + $0x18] sm:$0xff] }
 0xb90   :  { %v922_v55 = vadd.f32 %v1259_v57, %v921_v23  ;;  %v1063_v23 = vld [vmem:[#allocation7 + $0x10] sm:$0xff] }
 0xb91   :  { %v937_v54 = vadd.f32 %v1261_v58, %v936_v52  ;;  %v1061_v52 = vld [vmem:[#allocation7] sm:$0xff] }
 0xb92   :  { %v926_v15 = vsel %vm925_vm7, %v1259_v57, %v922_v55 }
 0xb93   :  { %v941_v10 = vsel %vm940_vm4, %v1261_v58, %v937_v54  ;;  %v931_v26 = vsel %vm928_vm9, %v930_v16, %v926_v15  ;;  %v1068_v58 = vld [vmem:[#allocation7 + $0x38] sm:$0xff] }
 0xb94   :  { %v946_v13 = vsel %vm943_vm5, %v945_v56, %v941_v10  ;;  %v954_v30 = vmul.f32 %v931_v26, %v856_v18  ;;  %1086 = vmatpush.msra.mxu2 %v1068_v58  ;;  %v1183_v10 = vld [vmem:[%s1764_s6] ss:$0 sm:$0xff] }
 0xb95   :  { %v949_v14 = vmul.f32 2.0, %v946_v13 }
 0xb96   :  { %1087 = vmatpush.msra.mxu2 %v1067_v48 }
 0xb97   :  { %v1166_v21 = vadd.f32 -1.0, %v949_v14 }
 0xb98   :  { %1088 = vmatpush.msra.mxu2 %v1066_v49 }
 0xb99   :  { %v953_v27 = vsel %vm174_vm8, %v1166_v21, %v946_v13 }
 0xb9a   :  { %v955_v28 = vmul.f32 %v953_v27, %v931_v26  ;;  %1089 = vmatpush.msra.mxu2 %v1065_v50 }
 0xb9c   :  { %957 = vrot.lane.b32.xlu2 %v955_v28, %s1383_s2  ;;  %1090 = vmatpush.msra.mxu2 %v1064_v22 }
 0xb9e   :  { %1091 = vmatpush.msra.mxu2 %v1063_v23 }
 0xba0   :  { %1092 = vmatpush.msra.mxu2 %v1062_v51 }
 0xba2   :  { %1093 = vmatpush.msra.mxu2 %v1061_v52 }
 0xbf6   :  { %v958_v31 = vpop.permute.xlu2 %957 }
 0xbf7   :  { %v1738_v32 = vadd.f32 %v958_v31, %v954_v30 }
 0xbf9   :  { %1262 = vtanh.f32 %v1738_v32 }
 0xbff   :  { %v1263_v34 = vpop.eup %1262 }
 0xc00   :  { %v962_v35 = vmul.f32 %v1263_v34, %v953_v27 }
 0xc02   :  { %964 = vrot.lane.b32.xlu0 %v962_v35, %s1383_s2 }
 0xc74   :  { %v965_v36 = vpop.permute.xlu0 %964 }
 0xc75   :  { %1167 = vmatmul.msk.f32.vlgmr.msra.gmra.mxu0 %vm98_vm0, %v965_v36  ;;  %1168 = vmatmul.msk.f32.vlgmr.msra.gmra.mxu1 %vm98_vm0, %v965_v36 }
 0xcf2   :  { %v985_v25 = vpop.f32.mrf.mxu0  ;;  %v1005_v37 = vpop.f32.mrf.mxu1 }
 0xcf3   :  { %v986_v38 = vadd.f32 %v985_v25, %v1588_v20  ;;  %v1006_v39 = vadd.f32 %v1005_v37, %v1591_v24 }
 0xcf5   :  { %v1169_v40 = vmul.f32 -1.442695, %v986_v38  ;;  %v1170_v59 = vmul.f32 -1.442695, %v1006_v39 }
 0xcf7   :  { %1264 = vpow2.f32 %v1169_v40 }
 0xcf8   :  { %1266 = vpow2.f32 %v1170_v59 }
 0xcfd   :  { %v1265_v60 = vpop.eup %1264 }
 0xcfe   :  { %v1267_v61 = vpop.eup %1266  ;;  %v1014_v62 = vadd.f32 1.0, %v1265_v60 }
 0xcff   :  { %v1015_v63 = vadd.f32 1.0, %v1267_v61 }
 0xd00   :  { %1268 = vrcp.f32 %v1014_v62  ;;  %v1027_v8 = vand.u32 2147483648, %v1014_v62  ;;  %vm1021_vm15 = vweird.f32 %v1014_v62  ;;  %v1025_v29 = vand.u32 2147483647, %v1014_v62 }
 0xd01   :  { %1270 = vrcp.f32 %v1015_v63  ;;  %v1042_v20 = vand.u32 2147483648, %v1015_v63  ;;  %v1040_v24 = vand.u32 2147483647, %v1015_v63  ;;  %vm1036_vm11 = vweird.f32 %v1015_v63 }
 0xd02   :  { %v1028_v44 = vor.u32 1.1754944e-38, %v1027_v8  ;;  %vm1026_vm2 = vcmp.eq.f32.partialorder %v1025_v29, 8.507059e+37 }
 0xd03   :  { %v1043_v7 = vor.u32 1.1754944e-38, %v1042_v20  ;;  %vm1041_vm14 = vcmp.eq.f32.partialorder %v1040_v24, 8.507059e+37 }
 0xd06   :  { %v1269_v0 = vpop.eup %1268 }
 0xd07   :  { %v1271_v1 = vpop.eup %1270  ;;  %v1017_v2 = vmul.f32 %v1269_v0, %v1014_v62  ;;  %vm1022_vm12 = vweird.f32 %v1269_v0 }
 0xd08   :  { %v1032_v18 = vmul.f32 %v1271_v1, %v1015_v63  ;;  %vm1037_vm10 = vweird.f32 %v1271_v1  ;;  %vm1023_vm1 = vmor %vm1021_vm15, %vm1022_vm12 }
 0xd09   :  { %v1018_v3 = vsub.f32 1.0, %v1017_v2  ;;  %vm1038_vm13 = vmor %vm1036_vm11, %vm1037_vm10 }
 0xd0a   :  { %v1033_v17 = vsub.f32 1.0, %v1032_v18 }
 0xd0b   :  { %v1019_v4 = vmul.f32 %v1269_v0, %v1018_v3 }
 0xd0c   :  { %v1034_v19 = vmul.f32 %v1271_v1, %v1033_v17 }
 0xd0d   :  { %v1020_v6 = vadd.f32 %v1269_v0, %v1019_v4 }
 0xd0e   :  { %v1035_v5 = vadd.f32 %v1271_v1, %v1034_v19 }
 0xd0f   :  { %v1024_v42 = vsel %vm1023_vm1, %v1269_v0, %v1020_v6 }
 0xd10   :  { %v1039_v11 = vsel %vm1038_vm13, %v1271_v1, %v1035_v5  ;;  %v1029_v46 = vsel %vm1026_vm2, %v1028_v44, %v1024_v42 }
 0xd11   :  { %v1044_v33 = vsel %vm1041_vm14, %v1043_v7, %v1039_v11  ;;  %v1052_v43 = vmul.f32 %v1029_v46, %v1738_v32 }
 0xd12   :  { %v1047_v41 = vmul.f32 2.0, %v1044_v33 }
 0xd14   :  { %v1172_v45 = vadd.f32 -1.0, %v1047_v41 }
 0xd16   :  { %v1051_v47 = vsel %vm174_vm8, %v1172_v45, %v1044_v33 }
 0xd17   :  { %v1053_v57 = vmul.f32 %v1051_v47, %v1029_v46 }
 0xd19   :  { %1055 = vrot.lane.b32.xlu1 %v1053_v57, %s1383_s2 }
 0xd8b   :  { %v1056_v53 = vpop.permute.xlu1 %1055 }
 0xd8c   :  { %v1058_v54 = vadd.f32 %v1056_v53, %v1052_v43 }
 0xd8e   :  { %1272 = vtanh.f32 %v1058_v54 }
 0xd94   :  { %v1273_v55 = vpop.eup %1272 }
 0xd95   :  { %v1060_v56 = vmul.f32 %v1273_v55, %v1051_v47 }
 0xd97   :  { %1074 = vrot.lane.b32.xlu2 %v1060_v56, %s1383_s2 }
 0xdf1   :  { %v1075_v9 = vpop.permute.xlu2 %1074 }
 0xdf2   :  { %1173 = vmatmul.msk.f32.vlgmr.msra.gmra.mxu2 %vm98_vm0, %v1075_v9 }
 0xe75   :  { %v1095_v12 = vpop.f32.mrf.mxu2 }
 0xe76   :  { %v1096_v13 = vadd.f32 %v1183_v10, %v1095_v12 }
 0xe78   :  { %1098 = vst [vmem:[#allocation8] sm:$0x3] %v1096_v13 }
 0xe79   :  { %1109 = dma.vmem_to_hbm [thread:$0]  %s1105_s26, 32, %s1107_s29, [#allocation4]  }
 0xe7a   :  { %1374 = dma.done.wait [#allocation4], 32  }
 0xe7b   :  { %1375 = vsyncadd [#allocation4], 4294967264 }
 0xe7c   :  { %1114 = vsyncpa [#allocation3], 1 }
 0xe7d   :  { %1115 = vsyncpa [#allocation6], 1 }
 0xe7e   :  { %1116 = vsyncpa [#allocation4], 1 }

</bundles_post_ra>
